<compile_context>
chip_gen: v5e
topology: v5e:2x2
jax: 0.10.0
libtpu: 0.0.40
codegen_flags: <defaults>
</compile_context>

<pallas_src>
import functools

import jax
import jax.numpy as jnp
import numpy as np
from jax import lax
from jax.experimental import pallas as pl
from jax.experimental.pallas import tpu as pltpu


def _round_up(x, m):
    return (x + m - 1) // m * m


def _vmem_budget_bytes():
    """Per-core VMEM budget with headroom; conservative fallback = v7x (64 MiB/TC)."""
    try:
        cap = int(pltpu.get_tpu_info().vmem_capacity_bytes)
    except Exception:
        cap = 64 * 1024 * 1024
    cap = min(cap, 128 * 1024 * 1024)
    return int(cap * 7 // 8)            # leave ~12.5% for compiler-internal scratch


def _derive_t_blk(S, b_blk, Hp, compute_dtype, out_dtype, vmem_limit, cap=64):
    """Largest time block whose double-buffered streams fit the VMEM budget."""
    ic = jnp.dtype(compute_dtype).itemsize
    io = jnp.dtype(out_dtype).itemsize
    fixed = Hp * 4 * Hp * ic                 # resident Wh^T (single-buffered scratch)
    fixed += 2 * b_blk * Hp * 4              # h/c carries (f32 scratch)
    fixed += 2 * 2 * b_blk * Hp * 4          # double-buffered final h/c output blocks
    per_t = 2 * b_blk * 4 * Hp * ic          # double-buffered xproj stream
    per_t += 2 * b_blk * Hp * io             # double-buffered h_seq writeback
    budget = int(vmem_limit * 0.75) - fixed
    t = budget // per_t if budget > 0 else 1
    return int(max(1, min(t, cap, S)))


def lstm_kernel(xproj_ref, wh_hbm_ref, hseq_ref, h_out_ref, c_out_ref,
                wh_vmem, wh_sem, h_sc, c_sc, *, t_blk, hp, s_real, mask_tail):
    """One grid step = one (batch block, time block); h/c carried in VMEM scratch.

    xproj_ref:  (t_blk, B_blk, 4*Hp)  precomputed x@Wx^T + (bx+bh), gate-aligned
    wh_hbm_ref: (Hp, 4*Hp)            Wh^T in HBM (memory_space=pl.ANY)
    hseq_ref:   (t_blk, B_blk, Hp)
    h_out_ref / c_out_ref: (B_blk, Hp)
    wh_vmem:    (Hp, 4*Hp)            single-buffered resident weight copy
    """
    t = pl.program_id(1)

    @pl.when(t == 0)
    def _():
        # One-shot weight residency (single-buffered, unlike a pipelined BlockSpec).
        cp = pltpu.make_async_copy(wh_hbm_ref, wh_vmem, wh_sem)
        cp.start()
        cp.wait()
        # h0 = c0 = 0, matching the PyTorch module when h/c are None.
        h_sc[...] = jnp.zeros_like(h_sc)
        c_sc[...] = jnp.zeros_like(c_sc)

    wh = wh_vmem[...]  # hoisted: loaded once per grid step

    def step(tt, carry):
        h_prev, c_prev = carry
        # Recurrent pre-activation only: (B_blk, Hp) @ (Hp, 4Hp) + precomputed x-part.
        pre = xproj_ref[tt].astype(jnp.float32) + jnp.dot(
            h_prev.astype(wh.dtype), wh, preferred_element_type=jnp.float32)
        # Gate slices are lane-aligned (Hp is a multiple of 128).
        gates = jax.nn.sigmoid(pre[:, :3 * hp])   # forget | input | output
        update = jnp.tanh(pre[:, 3 * hp:])        # candidate cell
        fg = gates[:, :hp]
        ig = gates[:, hp:2 * hp]
        og = gates[:, 2 * hp:]

        c_new = c_prev * fg + update * ig
        h_new = og * jnp.tanh(c_new)

        hseq_ref[tt] = h_new.astype(hseq_ref.dtype)

        if mask_tail:
            # Freeze the carry on padded trailing timesteps (S padded to t_blk multiple).
            valid = (t * t_blk + tt) < s_real
            h_new = jnp.where(valid, h_new, h_prev)
            c_new = jnp.where(valid, c_new, c_prev)
        return h_new, c_new

    h_fin, c_fin = lax.fori_loop(0, t_blk, step, (h_sc[...], c_sc[...]),
                                 unroll=min(t_blk, 8))
    h_sc[...] = h_fin
    c_sc[...] = c_fin

    @pl.when(t == pl.num_programs(1) - 1)
    def _():
        h_out_ref[...] = h_fin.astype(h_out_ref.dtype)
        c_out_ref[...] = c_fin.astype(c_out_ref.dtype)


def lstm_forward(x, wx, bx, wh, bh, *, compute_dtype=jnp.bfloat16,
                 out_dtype=jnp.float32, t_blk=None, b_blk=None):
    """
    x:  (S, B, I) float32
    wx: (4H, I)  bx: (4H,)   -- torch nn.Linear(input_size, 4H) params
    wh: (4H, H)  bh: (4H,)   -- torch nn.Linear(hidden_size, 4H) params
    Returns (h_seq, (h, c)) with shapes (S,B,H), (1,B,H), (1,B,H).

    compute_dtype: dtype of the MXU operands (xproj stream, Wh^T).  bf16 by default;
                   pass jnp.float32 for bit-tight numerics.  Accumulation/gates stay f32.
    out_dtype:     dtype of the h_seq writeback (bf16 halves HBM writeback on v5e).
    """
    S, B, I = x.shape
    H = wh.shape[1]
    f32 = jnp.float32

    # Padded, lane/sublane-aligned sizes.
    Hp = _round_up(H, 128)   # per-gate lane alignment
    Bp = _round_up(B, 8)     # f32 sublane alignment

    # --- Block sizes. ---------------------------------------------------------
    if b_blk is None:
        # Split the batch so the leading "parallel" axis can shard across v7x's 2 TCs.
        b_blk = Bp // 2 if (Bp >= 16 and Bp % 16 == 0) else Bp
    assert Bp % b_blk == 0 and b_blk % 8 == 0

    vmem_limit = _vmem_budget_bytes()
    if t_blk is None:
        t_blk = _derive_t_blk(S, b_blk, Hp, compute_dtype, out_dtype, vmem_limit)
    S_pad = _round_up(S, t_blk)
    n_tb = S_pad // t_blk
    n_bb = Bp // b_blk
    mask_tail = (S_pad != S)

    # --- Gate-aligned parameters (tiny tensors; padding them is free). --------
    wx_ga = jnp.asarray(wx, f32).T.reshape(I, 4, H)
    wx_ga = jnp.pad(wx_ga, ((0, 0), (0, 0), (0, Hp - H))).reshape(I, 4 * Hp)
    b_ga = (jnp.asarray(bx, f32) + jnp.asarray(bh, f32)).reshape(4, H)
    b_ga = jnp.pad(b_ga, ((0, 0), (0, Hp - H))).reshape(4 * Hp)
    wh_ga = jnp.asarray(wh, f32).T.reshape(H, 4, H)
    wh_ga = jnp.pad(wh_ga, ((0, Hp - H), (0, 0), (0, Hp - H))).reshape(Hp, 4 * Hp)
    wh_ga = wh_ga.astype(compute_dtype)

    # --- Hoisted input projection: one big GEMM straight into the padded, -----
    # --- gate-aligned (S_pad, Bp, 4*Hp) layout (no extra pad pass on xproj). ---
    x_p = jnp.pad(x.astype(f32), ((0, S_pad - S), (0, Bp - B), (0, 0)))
    xproj = (x_p.reshape(S_pad * Bp, I) @ wx_ga + b_ga).astype(compute_dtype)
    xproj = xproj.reshape(S_pad, Bp, 4 * Hp)

    kernel = functools.partial(lstm_kernel, t_blk=t_blk, hp=Hp,
                               s_real=S, mask_tail=mask_tail)

    h_seq_p, h_fin_p, c_fin_p = pl.pallas_call(
        kernel,
        out_shape=(
            jax.ShapeDtypeStruct((S_pad, Bp, Hp), out_dtype),
            jax.ShapeDtypeStruct((Bp, Hp), jnp.float32),
            jax.ShapeDtypeStruct((Bp, Hp), jnp.float32),
        ),
        grid_spec=pltpu.PrefetchScalarGridSpec(
            num_scalar_prefetch=0,
            grid=(n_bb, n_tb),
            in_specs=[
                pl.BlockSpec((t_blk, b_blk, 4 * Hp), lambda b, t: (t, b, 0)),  # xproj
                pl.BlockSpec(memory_space=pl.ANY),                             # Wh^T (HBM)
            ],
            out_specs=[
                pl.BlockSpec((t_blk, b_blk, Hp), lambda b, t: (t, b, 0)),      # h_seq
                pl.BlockSpec((b_blk, Hp), lambda b, t: (b, 0)),                # final h
                pl.BlockSpec((b_blk, Hp), lambda b, t: (b, 0)),                # final c
            ],
            scratch_shapes=[
                pltpu.VMEM((Hp, 4 * Hp), compute_dtype),  # resident Wh^T (single-buffered)
                pltpu.SemaphoreType.DMA(()),              # weight-copy semaphore
                pltpu.VMEM((b_blk, Hp), jnp.float32),     # h carry
                pltpu.VMEM((b_blk, Hp), jnp.float32),     # c carry
            ],
        ),
        compiler_params=pltpu.CompilerParams(
            # batch blocks are independent ("parallel"); time is a true recurrence.
            dimension_semantics=("parallel", "arbitrary"),
            vmem_limit_bytes=vmem_limit,
        ),
    )(xproj, wh_ga)

    # Strip padding.
    h_seq = h_seq_p[:S, :B, :H]
    h_fin = h_fin_p[None, :B, :H]
    c_fin = c_fin_p[None, :B, :H]
    return h_seq, (h_fin, c_fin)


def lstm_reference(x, wx, bx, wh, bh):
    """Pure-JAX reference mirroring the PyTorch forward exactly."""
    S, B, I = x.shape
    H = wh.shape[1]
    h = jnp.zeros((B, H), jnp.float32)
    c = jnp.zeros((B, H), jnp.float32)
    hs = []
    for t in range(S):
        pre = x[t] @ wx.T + bx + h @ wh.T + bh
        gates = jax.nn.sigmoid(pre[:, :3 * H])
        update = jnp.tanh(pre[:, 3 * H:])
        fg, ig, og = gates[:, :H], gates[:, H:2 * H], gates[:, 2 * H:]
        c = c * fg + update * ig
        h = og * jnp.tanh(c)
        hs.append(h)
    h_seq = jnp.stack(hs, axis=0)
    return h_seq, (h[None], c[None])


def _make_params(key, seq_len, batch, input_size, hidden_size):
    kx, kwx, kbx, kwh, kbh = jax.random.split(key, 5)
    x = jax.random.normal(kx, (seq_len, batch, input_size), dtype=jnp.float32)
    # Deterministic "nn.Linear"-style init (uniform in +/- 1/sqrt(fan_in)).
    bnd_x = 1.0 / np.sqrt(input_size)
    bnd_h = 1.0 / np.sqrt(hidden_size)
    wx = jax.random.uniform(kwx, (4 * hidden_size, input_size), jnp.float32, -bnd_x, bnd_x)
    bx = jax.random.uniform(kbx, (4 * hidden_size,), jnp.float32, -bnd_x, bnd_x)
    wh = jax.random.uniform(kwh, (4 * hidden_size, hidden_size), jnp.float32, -bnd_h, bnd_h)
    bh = jax.random.uniform(kbh, (4 * hidden_size,), jnp.float32, -bnd_h, bnd_h)
    return x, wx, bx, wh, bh


def _check(got, want, rtol, atol):
    h_seq, (h_f, c_f) = got
    h_seq_r, (h_r, c_r) = want
    np.testing.assert_allclose(np.asarray(h_seq, np.float32), np.asarray(h_seq_r),
                               rtol=rtol, atol=atol)
    np.testing.assert_allclose(np.asarray(h_f, np.float32), np.asarray(h_r),
                               rtol=rtol, atol=atol)
    np.testing.assert_allclose(np.asarray(c_f, np.float32), np.asarray(c_r),
                               rtol=rtol, atol=atol)


if __name__ == "__main__":
    key = jax.random.PRNGKey(0)

    # --- Test 1: f32 operands, exact path (1e-5). -----------------------------
    x, wx, bx, wh, bh = _make_params(key, seq_len=8, batch=2, input_size=4, hidden_size=32)
    ref = lstm_reference(x, wx, bx, wh, bh)

    out_f32 = lstm_forward(x, wx, bx, wh, bh, compute_dtype=jnp.float32)
    jax.block_until_ready(out_f32)
    _check(out_f32, ref, rtol=1e-5, atol=1e-5)

    # --- Test 2: default bf16 MXU operands (f32 accumulation / gates). --------
    out_bf16 = lstm_forward(x, wx, bx, wh, bh)          # compute_dtype=bf16 default
    jax.block_until_ready(out_bf16)
    _check(out_bf16, ref, rtol=2e-2, atol=2e-2)

    # --- Test 3: multi batch-block + padded (non-divisible) sequence tail. ----
    x3, wx3, bx3, wh3, bh3 = _make_params(jax.random.PRNGKey(1),
                                          seq_len=12, batch=16, input_size=4, hidden_size=32)
    ref3 = lstm_reference(x3, wx3, bx3, wh3, bh3)
    out3 = lstm_forward(x3, wx3, bx3, wh3, bh3, compute_dtype=jnp.float32, t_blk=8)
    jax.block_until_ready(out3)
    _check(out3, ref3, rtol=1e-5, atol=1e-5)

    print("KERNEL_OK")
</pallas_src>

<mosaic_0001>
module attributes {stable_mosaic.version = 11 : i64} {
  func.func @lstm_kernel(%arg0: i32, %arg1: i32, %arg2: memref<8x8x512xf32, #tpu.memory_space<vmem>>, %arg3: memref<128x512xf32, #tpu.memory_space<any>>, %arg4: memref<8x8x128xf32, #tpu.memory_space<vmem>>, %arg5: memref<8x128xf32, #tpu.memory_space<vmem>>, %arg6: memref<8x128xf32, #tpu.memory_space<vmem>>, %arg7: memref<128x512xf32, #tpu.memory_space<vmem>>, %arg8: memref<!tpu.dma_semaphore, #tpu.memory_space<semaphore_mem>>, %arg9: memref<8x128xf32, #tpu.memory_space<vmem>>, %arg10: memref<8x128xf32, #tpu.memory_space<vmem>>) attributes {dimension_semantics = [#tpu.dimension_semantics<parallel>, #tpu.dimension_semantics<arbitrary>], iteration_bounds = array<i64: 1, 1>, scalar_prefetch = 0 : i64, scratch_operands = 4 : i64, tpu.core_type = #tpu.core_type<tc>, window_params = [{transform_indices = @transform_0, window_bounds = array<i64: 8, 8, 512>}, {}, {transform_indices = @transform_2, window_bounds = array<i64: 8, 8, 128>}, {transform_indices = @transform_3, window_bounds = array<i64: 8, 128>}, {transform_indices = @transform_4, window_bounds = array<i64: 8, 128>}]} {
    %c0_i32 = arith.constant 0 : i32
    %0 = arith.cmpi eq, %arg1, %c0_i32 : i32
    %1 = arith.extui %0 : i1 to i32
    %c0_i32_0 = arith.constant 0 : i32
    %2 = arith.cmpi ne, %1, %c0_i32_0 : i32
    scf.if %2 {
      tpu.enqueue_dma source(%arg3 : memref<128x512xf32, #tpu.memory_space<any>>) target(%arg7 : memref<128x512xf32, #tpu.memory_space<vmem>>) target_semaphore(%arg8 : memref<!tpu.dma_semaphore, #tpu.memory_space<semaphore_mem>>)
      tpu.wait_dma2 semaphore(%arg8 : memref<!tpu.dma_semaphore, #tpu.memory_space<semaphore_mem>>) src(%arg3 : memref<128x512xf32, #tpu.memory_space<any>>) dst(%arg7 : memref<128x512xf32, #tpu.memory_space<vmem>>)
      %cst_60 = arith.constant 0.000000e+00 : f32
      %211 = vector.broadcast %cst_60 : f32 to vector<8x128xf32>
      %c0_61 = arith.constant 0 : index
      %c0_62 = arith.constant 0 : index
      %212 = vector.load %arg9[%c0_61, %c0_62] : memref<8x128xf32, #tpu.memory_space<vmem>>, vector<8x128xf32>
      tpu.vector_store %arg9[%c0_61, %c0_62], %211 {strides = array<i32>} : memref<8x128xf32, #tpu.memory_space<vmem>>, vector<8x128xf32>,
      %cst_63 = arith.constant 0.000000e+00 : f32
      %213 = vector.broadcast %cst_63 : f32 to vector<8x128xf32>
      %c0_64 = arith.constant 0 : index
      %c0_65 = arith.constant 0 : index
      %214 = vector.load %arg10[%c0_64, %c0_65] : memref<8x128xf32, #tpu.memory_space<vmem>>, vector<8x128xf32>
      tpu.vector_store %arg10[%c0_64, %c0_65], %213 {strides = array<i32>} : memref<8x128xf32, #tpu.memory_space<vmem>>, vector<8x128xf32>,
    } else {
    }
    %c0 = arith.constant 0 : index
    %c0_1 = arith.constant 0 : index
    %3 = vector.load %arg7[%c0, %c0_1] : memref<128x512xf32, #tpu.memory_space<vmem>>, vector<128x512xf32>
    %c0_2 = arith.constant 0 : index
    %c0_3 = arith.constant 0 : index
    %4 = vector.load %arg9[%c0_2, %c0_3] : memref<8x128xf32, #tpu.memory_space<vmem>>, vector<8x128xf32>
    %c0_4 = arith.constant 0 : index
    %c0_5 = arith.constant 0 : index
    %5 = vector.load %arg10[%c0_4, %c0_5] : memref<8x128xf32, #tpu.memory_space<vmem>>, vector<8x128xf32>
    %c0_i32_6 = arith.constant 0 : i32
    %6 = arith.index_cast %c0_i32_6 : i32 to index
    %c0_7 = arith.constant 0 : index
    %c0_8 = arith.constant 0 : index
    %7 = vector.load %arg2[%6, %c0_7, %c0_8] : memref<8x8x512xf32, #tpu.memory_space<vmem>>, vector<1x8x512xf32>
    %8 = vector.shape_cast %7 : vector<1x8x512xf32> to vector<8x512xf32>
    %cst = arith.constant dense<0.000000e+00> : vector<8x512xf32>
    %9 = tpu.matmul %4, %3, %cst {dimension_numbers = #tpu.dot_dimension_numbers<[1], [0], [0], [1], [0, 0, 1, 1], [], []>} : vector<8x128xf32>, vector<128x512xf32>, vector<8x512xf32> -> vector<8x512xf32>
    %10 = arith.addf %8, %9 : vector<8x512xf32>
    %11 = vector.extract_strided_slice %10 {offsets = [0, 0], sizes = [8, 384], strides = [1, 1]} : vector<8x512xf32> to vector<8x384xf32>
    %12 = arith.negf %11 : vector<8x384xf32>
    %13 = math.exp %12 : vector<8x384xf32>
    %cst_9 = arith.constant 1.000000e+00 : f32
    %14 = vector.broadcast %cst_9 : f32 to vector<8x384xf32>
    %15 = arith.addf %14, %13 : vector<8x384xf32>
    %16 = arith.divf %14, %15 : vector<8x384xf32>
    %17 = vector.extract_strided_slice %10 {offsets = [0, 384], sizes = [8, 128], strides = [1, 1]} : vector<8x512xf32> to vector<8x128xf32>
    %18 = math.tanh %17 : vector<8x128xf32>
    %19 = vector.extract_strided_slice %16 {offsets = [0, 0], sizes = [8, 128], strides = [1, 1]} : vector<8x384xf32> to vector<8x128xf32>
    %20 = vector.extract_strided_slice %16 {offsets = [0, 128], sizes = [8, 128], strides = [1, 1]} : vector<8x384xf32> to vector<8x128xf32>
    %21 = vector.extract_strided_slice %16 {offsets = [0, 256], sizes = [8, 128], strides = [1, 1]} : vector<8x384xf32> to vector<8x128xf32>
    %22 = arith.mulf %5, %19 : vector<8x128xf32>
    %23 = arith.mulf %18, %20 : vector<8x128xf32>
    %24 = arith.addf %22, %23 : vector<8x128xf32>
    %25 = math.tanh %24 : vector<8x128xf32>
    %26 = arith.mulf %21, %25 : vector<8x128xf32>
    %27 = arith.index_cast %c0_i32_6 : i32 to index
    %c0_10 = arith.constant 0 : index
    %c0_11 = arith.constant 0 : index
    %28 = vector.load %arg4[%27, %c0_10, %c0_11] : memref<8x8x128xf32, #tpu.memory_space<vmem>>, vector<1x8x128xf32>
    %29 = vector.shape_cast %28 : vector<1x8x128xf32> to vector<8x128xf32>
    %30 = vector.shape_cast %26 : vector<8x128xf32> to vector<1x8x128xf32>
    tpu.vector_store %arg4[%27, %c0_10, %c0_11], %30 {strides = array<i32>} : memref<8x8x128xf32, #tpu.memory_space<vmem>>, vector<1x8x128xf32>,
    %c1_i32 = arith.constant 1 : i32
    %31 = arith.index_cast %c1_i32 : i32 to index
    %c0_12 = arith.constant 0 : index
    %c0_13 = arith.constant 0 : index
    %32 = vector.load %arg2[%31, %c0_12, %c0_13] : memref<8x8x512xf32, #tpu.memory_space<vmem>>, vector<1x8x512xf32>
    %33 = vector.shape_cast %32 : vector<1x8x512xf32> to vector<8x512xf32>
    %cst_14 = arith.constant dense<0.000000e+00> : vector<8x512xf32>
    %34 = tpu.matmul %26, %3, %cst_14 {dimension_numbers = #tpu.dot_dimension_numbers<[1], [0], [0], [1], [0, 0, 1, 1], [], []>} : vector<8x128xf32>, vector<128x512xf32>, vector<8x512xf32> -> vector<8x512xf32>
    %35 = arith.addf %33, %34 : vector<8x512xf32>
    %36 = vector.extract_strided_slice %35 {offsets = [0, 0], sizes = [8, 384], strides = [1, 1]} : vector<8x512xf32> to vector<8x384xf32>
    %37 = arith.negf %36 : vector<8x384xf32>
    %38 = math.exp %37 : vector<8x384xf32>
    %cst_15 = arith.constant 1.000000e+00 : f32
    %39 = vector.broadcast %cst_15 : f32 to vector<8x384xf32>
    %40 = arith.addf %39, %38 : vector<8x384xf32>
    %41 = arith.divf %39, %40 : vector<8x384xf32>
    %42 = vector.extract_strided_slice %35 {offsets = [0, 384], sizes = [8, 128], strides = [1, 1]} : vector<8x512xf32> to vector<8x128xf32>
    %43 = math.tanh %42 : vector<8x128xf32>
    %44 = vector.extract_strided_slice %41 {offsets = [0, 0], sizes = [8, 128], strides = [1, 1]} : vector<8x384xf32> to vector<8x128xf32>
    %45 = vector.extract_strided_slice %41 {offsets = [0, 128], sizes = [8, 128], strides = [1, 1]} : vector<8x384xf32> to vector<8x128xf32>
    %46 = vector.extract_strided_slice %41 {offsets = [0, 256], sizes = [8, 128], strides = [1, 1]} : vector<8x384xf32> to vector<8x128xf32>
    %47 = arith.mulf %24, %44 : vector<8x128xf32>
    %48 = arith.mulf %43, %45 : vector<8x128xf32>
    %49 = arith.addf %47, %48 : vector<8x128xf32>
    %50 = math.tanh %49 : vector<8x128xf32>
    %51 = arith.mulf %46, %50 : vector<8x128xf32>
    %52 = arith.index_cast %c1_i32 : i32 to index
    %c0_16 = arith.constant 0 : index
    %c0_17 = arith.constant 0 : index
    %53 = vector.load %arg4[%52, %c0_16, %c0_17] : memref<8x8x128xf32, #tpu.memory_space<vmem>>, vector<1x8x128xf32>
    %54 = vector.shape_cast %53 : vector<1x8x128xf32> to vector<8x128xf32>
    %55 = vector.shape_cast %51 : vector<8x128xf32> to vector<1x8x128xf32>
    tpu.vector_store %arg4[%52, %c0_16, %c0_17], %55 {strides = array<i32>} : memref<8x8x128xf32, #tpu.memory_space<vmem>>, vector<1x8x128xf32>,
    %c2_i32 = arith.constant 2 : i32
    %56 = arith.index_cast %c2_i32 : i32 to index
    %c0_18 = arith.constant 0 : index
    %c0_19 = arith.constant 0 : index
    %57 = vector.load %arg2[%56, %c0_18, %c0_19] : memref<8x8x512xf32, #tpu.memory_space<vmem>>, vector<1x8x512xf32>
    %58 = vector.shape_cast %57 : vector<1x8x512xf32> to vector<8x512xf32>
    %cst_20 = arith.constant dense<0.000000e+00> : vector<8x512xf32>
    %59 = tpu.matmul %51, %3, %cst_20 {dimension_numbers = #tpu.dot_dimension_numbers<[1], [0], [0], [1], [0, 0, 1, 1], [], []>} : vector<8x128xf32>, vector<128x512xf32>, vector<8x512xf32> -> vector<8x512xf32>
    %60 = arith.addf %58, %59 : vector<8x512xf32>
    %61 = vector.extract_strided_slice %60 {offsets = [0, 0], sizes = [8, 384], strides = [1, 1]} : vector<8x512xf32> to vector<8x384xf32>
    %62 = arith.negf %61 : vector<8x384xf32>
    %63 = math.exp %62 : vector<8x384xf32>
    %cst_21 = arith.constant 1.000000e+00 : f32
    %64 = vector.broadcast %cst_21 : f32 to vector<8x384xf32>
    %65 = arith.addf %64, %63 : vector<8x384xf32>
    %66 = arith.divf %64, %65 : vector<8x384xf32>
    %67 = vector.extract_strided_slice %60 {offsets = [0, 384], sizes = [8, 128], strides = [1, 1]} : vector<8x512xf32> to vector<8x128xf32>
    %68 = math.tanh %67 : vector<8x128xf32>
    %69 = vector.extract_strided_slice %66 {offsets = [0, 0], sizes = [8, 128], strides = [1, 1]} : vector<8x384xf32> to vector<8x128xf32>
    %70 = vector.extract_strided_slice %66 {offsets = [0, 128], sizes = [8, 128], strides = [1, 1]} : vector<8x384xf32> to vector<8x128xf32>
    %71 = vector.extract_strided_slice %66 {offsets = [0, 256], sizes = [8, 128], strides = [1, 1]} : vector<8x384xf32> to vector<8x128xf32>
    %72 = arith.mulf %49, %69 : vector<8x128xf32>
    %73 = arith.mulf %68, %70 : vector<8x128xf32>
    %74 = arith.addf %72, %73 : vector<8x128xf32>
    %75 = math.tanh %74 : vector<8x128xf32>
    %76 = arith.mulf %71, %75 : vector<8x128xf32>
    %77 = arith.index_cast %c2_i32 : i32 to index
    %c0_22 = arith.constant 0 : index
    %c0_23 = arith.constant 0 : index
    %78 = vector.load %arg4[%77, %c0_22, %c0_23] : memref<8x8x128xf32, #tpu.memory_space<vmem>>, vector<1x8x128xf32>
    %79 = vector.shape_cast %78 : vector<1x8x128xf32> to vector<8x128xf32>
    %80 = vector.shape_cast %76 : vector<8x128xf32> to vector<1x8x128xf32>
    tpu.vector_store %arg4[%77, %c0_22, %c0_23], %80 {strides = array<i32>} : memref<8x8x128xf32, #tpu.memory_space<vmem>>, vector<1x8x128xf32>,
    %c3_i32 = arith.constant 3 : i32
    %81 = arith.index_cast %c3_i32 : i32 to index
    %c0_24 = arith.constant 0 : index
    %c0_25 = arith.constant 0 : index
    %82 = vector.load %arg2[%81, %c0_24, %c0_25] : memref<8x8x512xf32, #tpu.memory_space<vmem>>, vector<1x8x512xf32>
    %83 = vector.shape_cast %82 : vector<1x8x512xf32> to vector<8x512xf32>
    %cst_26 = arith.constant dense<0.000000e+00> : vector<8x512xf32>
    %84 = tpu.matmul %76, %3, %cst_26 {dimension_numbers = #tpu.dot_dimension_numbers<[1], [0], [0], [1], [0, 0, 1, 1], [], []>} : vector<8x128xf32>, vector<128x512xf32>, vector<8x512xf32> -> vector<8x512xf32>
    %85 = arith.addf %83, %84 : vector<8x512xf32>
    %86 = vector.extract_strided_slice %85 {offsets = [0, 0], sizes = [8, 384], strides = [1, 1]} : vector<8x512xf32> to vector<8x384xf32>
    %87 = arith.negf %86 : vector<8x384xf32>
    %88 = math.exp %87 : vector<8x384xf32>
    %cst_27 = arith.constant 1.000000e+00 : f32
    %89 = vector.broadcast %cst_27 : f32 to vector<8x384xf32>
    %90 = arith.addf %89, %88 : vector<8x384xf32>
    %91 = arith.divf %89, %90 : vector<8x384xf32>
    %92 = vector.extract_strided_slice %85 {offsets = [0, 384], sizes = [8, 128], strides = [1, 1]} : vector<8x512xf32> to vector<8x128xf32>
    %93 = math.tanh %92 : vector<8x128xf32>
    %94 = vector.extract_strided_slice %91 {offsets = [0, 0], sizes = [8, 128], strides = [1, 1]} : vector<8x384xf32> to vector<8x128xf32>
    %95 = vector.extract_strided_slice %91 {offsets = [0, 128], sizes = [8, 128], strides = [1, 1]} : vector<8x384xf32> to vector<8x128xf32>
    %96 = vector.extract_strided_slice %91 {offsets = [0, 256], sizes = [8, 128], strides = [1, 1]} : vector<8x384xf32> to vector<8x128xf32>
    %97 = arith.mulf %74, %94 : vector<8x128xf32>
    %98 = arith.mulf %93, %95 : vector<8x128xf32>
    %99 = arith.addf %97, %98 : vector<8x128xf32>
    %100 = math.tanh %99 : vector<8x128xf32>
    %101 = arith.mulf %96, %100 : vector<8x128xf32>
    %102 = arith.index_cast %c3_i32 : i32 to index
    %c0_28 = arith.constant 0 : index
    %c0_29 = arith.constant 0 : index
    %103 = vector.load %arg4[%102, %c0_28, %c0_29] : memref<8x8x128xf32, #tpu.memory_space<vmem>>, vector<1x8x128xf32>
    %104 = vector.shape_cast %103 : vector<1x8x128xf32> to vector<8x128xf32>
    %105 = vector.shape_cast %101 : vector<8x128xf32> to vector<1x8x128xf32>
    tpu.vector_store %arg4[%102, %c0_28, %c0_29], %105 {strides = array<i32>} : memref<8x8x128xf32, #tpu.memory_space<vmem>>, vector<1x8x128xf32>,
    %c4_i32 = arith.constant 4 : i32
    %106 = arith.index_cast %c4_i32 : i32 to index
    %c0_30 = arith.constant 0 : index
    %c0_31 = arith.constant 0 : index
    %107 = vector.load %arg2[%106, %c0_30, %c0_31] : memref<8x8x512xf32, #tpu.memory_space<vmem>>, vector<1x8x512xf32>
    %108 = vector.shape_cast %107 : vector<1x8x512xf32> to vector<8x512xf32>
    %cst_32 = arith.constant dense<0.000000e+00> : vector<8x512xf32>
    %109 = tpu.matmul %101, %3, %cst_32 {dimension_numbers = #tpu.dot_dimension_numbers<[1], [0], [0], [1], [0, 0, 1, 1], [], []>} : vector<8x128xf32>, vector<128x512xf32>, vector<8x512xf32> -> vector<8x512xf32>
    %110 = arith.addf %108, %109 : vector<8x512xf32>
    %111 = vector.extract_strided_slice %110 {offsets = [0, 0], sizes = [8, 384], strides = [1, 1]} : vector<8x512xf32> to vector<8x384xf32>
    %112 = arith.negf %111 : vector<8x384xf32>
    %113 = math.exp %112 : vector<8x384xf32>
    %cst_33 = arith.constant 1.000000e+00 : f32
    %114 = vector.broadcast %cst_33 : f32 to vector<8x384xf32>
    %115 = arith.addf %114, %113 : vector<8x384xf32>
    %116 = arith.divf %114, %115 : vector<8x384xf32>
    %117 = vector.extract_strided_slice %110 {offsets = [0, 384], sizes = [8, 128], strides = [1, 1]} : vector<8x512xf32> to vector<8x128xf32>
    %118 = math.tanh %117 : vector<8x128xf32>
    %119 = vector.extract_strided_slice %116 {offsets = [0, 0], sizes = [8, 128], strides = [1, 1]} : vector<8x384xf32> to vector<8x128xf32>
    %120 = vector.extract_strided_slice %116 {offsets = [0, 128], sizes = [8, 128], strides = [1, 1]} : vector<8x384xf32> to vector<8x128xf32>
    %121 = vector.extract_strided_slice %116 {offsets = [0, 256], sizes = [8, 128], strides = [1, 1]} : vector<8x384xf32> to vector<8x128xf32>
    %122 = arith.mulf %99, %119 : vector<8x128xf32>
    %123 = arith.mulf %118, %120 : vector<8x128xf32>
    %124 = arith.addf %122, %123 : vector<8x128xf32>
    %125 = math.tanh %124 : vector<8x128xf32>
    %126 = arith.mulf %121, %125 : vector<8x128xf32>
    %127 = arith.index_cast %c4_i32 : i32 to index
    %c0_34 = arith.constant 0 : index
    %c0_35 = arith.constant 0 : index
    %128 = vector.load %arg4[%127, %c0_34, %c0_35] : memref<8x8x128xf32, #tpu.memory_space<vmem>>, vector<1x8x128xf32>
    %129 = vector.shape_cast %128 : vector<1x8x128xf32> to vector<8x128xf32>
    %130 = vector.shape_cast %126 : vector<8x128xf32> to vector<1x8x128xf32>
    tpu.vector_store %arg4[%127, %c0_34, %c0_35], %130 {strides = array<i32>} : memref<8x8x128xf32, #tpu.memory_space<vmem>>, vector<1x8x128xf32>,
    %c5_i32 = arith.constant 5 : i32
    %131 = arith.index_cast %c5_i32 : i32 to index
    %c0_36 = arith.constant 0 : index
    %c0_37 = arith.constant 0 : index
    %132 = vector.load %arg2[%131, %c0_36, %c0_37] : memref<8x8x512xf32, #tpu.memory_space<vmem>>, vector<1x8x512xf32>
    %133 = vector.shape_cast %132 : vector<1x8x512xf32> to vector<8x512xf32>
    %cst_38 = arith.constant dense<0.000000e+00> : vector<8x512xf32>
    %134 = tpu.matmul %126, %3, %cst_38 {dimension_numbers = #tpu.dot_dimension_numbers<[1], [0], [0], [1], [0, 0, 1, 1], [], []>} : vector<8x128xf32>, vector<128x512xf32>, vector<8x512xf32> -> vector<8x512xf32>
    %135 = arith.addf %133, %134 : vector<8x512xf32>
    %136 = vector.extract_strided_slice %135 {offsets = [0, 0], sizes = [8, 384], strides = [1, 1]} : vector<8x512xf32> to vector<8x384xf32>
    %137 = arith.negf %136 : vector<8x384xf32>
    %138 = math.exp %137 : vector<8x384xf32>
    %cst_39 = arith.constant 1.000000e+00 : f32
    %139 = vector.broadcast %cst_39 : f32 to vector<8x384xf32>
    %140 = arith.addf %139, %138 : vector<8x384xf32>
    %141 = arith.divf %139, %140 : vector<8x384xf32>
    %142 = vector.extract_strided_slice %135 {offsets = [0, 384], sizes = [8, 128], strides = [1, 1]} : vector<8x512xf32> to vector<8x128xf32>
    %143 = math.tanh %142 : vector<8x128xf32>
    %144 = vector.extract_strided_slice %141 {offsets = [0, 0], sizes = [8, 128], strides = [1, 1]} : vector<8x384xf32> to vector<8x128xf32>
    %145 = vector.extract_strided_slice %141 {offsets = [0, 128], sizes = [8, 128], strides = [1, 1]} : vector<8x384xf32> to vector<8x128xf32>
    %146 = vector.extract_strided_slice %141 {offsets = [0, 256], sizes = [8, 128], strides = [1, 1]} : vector<8x384xf32> to vector<8x128xf32>
    %147 = arith.mulf %124, %144 : vector<8x128xf32>
    %148 = arith.mulf %143, %145 : vector<8x128xf32>
    %149 = arith.addf %147, %148 : vector<8x128xf32>
    %150 = math.tanh %149 : vector<8x128xf32>
    %151 = arith.mulf %146, %150 : vector<8x128xf32>
    %152 = arith.index_cast %c5_i32 : i32 to index
    %c0_40 = arith.constant 0 : index
    %c0_41 = arith.constant 0 : index
    %153 = vector.load %arg4[%152, %c0_40, %c0_41] : memref<8x8x128xf32, #tpu.memory_space<vmem>>, vector<1x8x128xf32>
    %154 = vector.shape_cast %153 : vector<1x8x128xf32> to vector<8x128xf32>
    %155 = vector.shape_cast %151 : vector<8x128xf32> to vector<1x8x128xf32>
    tpu.vector_store %arg4[%152, %c0_40, %c0_41], %155 {strides = array<i32>} : memref<8x8x128xf32, #tpu.memory_space<vmem>>, vector<1x8x128xf32>,
    %c6_i32 = arith.constant 6 : i32
    %156 = arith.index_cast %c6_i32 : i32 to index
    %c0_42 = arith.constant 0 : index
    %c0_43 = arith.constant 0 : index
    %157 = vector.load %arg2[%156, %c0_42, %c0_43] : memref<8x8x512xf32, #tpu.memory_space<vmem>>, vector<1x8x512xf32>
    %158 = vector.shape_cast %157 : vector<1x8x512xf32> to vector<8x512xf32>
    %cst_44 = arith.constant dense<0.000000e+00> : vector<8x512xf32>
    %159 = tpu.matmul %151, %3, %cst_44 {dimension_numbers = #tpu.dot_dimension_numbers<[1], [0], [0], [1], [0, 0, 1, 1], [], []>} : vector<8x128xf32>, vector<128x512xf32>, vector<8x512xf32> -> vector<8x512xf32>
    %160 = arith.addf %158, %159 : vector<8x512xf32>
    %161 = vector.extract_strided_slice %160 {offsets = [0, 0], sizes = [8, 384], strides = [1, 1]} : vector<8x512xf32> to vector<8x384xf32>
    %162 = arith.negf %161 : vector<8x384xf32>
    %163 = math.exp %162 : vector<8x384xf32>
    %cst_45 = arith.constant 1.000000e+00 : f32
    %164 = vector.broadcast %cst_45 : f32 to vector<8x384xf32>
    %165 = arith.addf %164, %163 : vector<8x384xf32>
    %166 = arith.divf %164, %165 : vector<8x384xf32>
    %167 = vector.extract_strided_slice %160 {offsets = [0, 384], sizes = [8, 128], strides = [1, 1]} : vector<8x512xf32> to vector<8x128xf32>
    %168 = math.tanh %167 : vector<8x128xf32>
    %169 = vector.extract_strided_slice %166 {offsets = [0, 0], sizes = [8, 128], strides = [1, 1]} : vector<8x384xf32> to vector<8x128xf32>
    %170 = vector.extract_strided_slice %166 {offsets = [0, 128], sizes = [8, 128], strides = [1, 1]} : vector<8x384xf32> to vector<8x128xf32>
    %171 = vector.extract_strided_slice %166 {offsets = [0, 256], sizes = [8, 128], strides = [1, 1]} : vector<8x384xf32> to vector<8x128xf32>
    %172 = arith.mulf %149, %169 : vector<8x128xf32>
    %173 = arith.mulf %168, %170 : vector<8x128xf32>
    %174 = arith.addf %172, %173 : vector<8x128xf32>
    %175 = math.tanh %174 : vector<8x128xf32>
    %176 = arith.mulf %171, %175 : vector<8x128xf32>
    %177 = arith.index_cast %c6_i32 : i32 to index
    %c0_46 = arith.constant 0 : index
    %c0_47 = arith.constant 0 : index
    %178 = vector.load %arg4[%177, %c0_46, %c0_47] : memref<8x8x128xf32, #tpu.memory_space<vmem>>, vector<1x8x128xf32>
    %179 = vector.shape_cast %178 : vector<1x8x128xf32> to vector<8x128xf32>
    %180 = vector.shape_cast %176 : vector<8x128xf32> to vector<1x8x128xf32>
    tpu.vector_store %arg4[%177, %c0_46, %c0_47], %180 {strides = array<i32>} : memref<8x8x128xf32, #tpu.memory_space<vmem>>, vector<1x8x128xf32>,
    %c7_i32 = arith.constant 7 : i32
    %181 = arith.index_cast %c7_i32 : i32 to index
    %c0_48 = arith.constant 0 : index
    %c0_49 = arith.constant 0 : index
    %182 = vector.load %arg2[%181, %c0_48, %c0_49] : memref<8x8x512xf32, #tpu.memory_space<vmem>>, vector<1x8x512xf32>
    %183 = vector.shape_cast %182 : vector<1x8x512xf32> to vector<8x512xf32>
    %cst_50 = arith.constant dense<0.000000e+00> : vector<8x512xf32>
    %184 = tpu.matmul %176, %3, %cst_50 {dimension_numbers = #tpu.dot_dimension_numbers<[1], [0], [0], [1], [0, 0, 1, 1], [], []>} : vector<8x128xf32>, vector<128x512xf32>, vector<8x512xf32> -> vector<8x512xf32>
    %185 = arith.addf %183, %184 : vector<8x512xf32>
    %186 = vector.extract_strided_slice %185 {offsets = [0, 0], sizes = [8, 384], strides = [1, 1]} : vector<8x512xf32> to vector<8x384xf32>
    %187 = arith.negf %186 : vector<8x384xf32>
    %188 = math.exp %187 : vector<8x384xf32>
    %cst_51 = arith.constant 1.000000e+00 : f32
    %189 = vector.broadcast %cst_51 : f32 to vector<8x384xf32>
    %190 = arith.addf %189, %188 : vector<8x384xf32>
    %191 = arith.divf %189, %190 : vector<8x384xf32>
    %192 = vector.extract_strided_slice %185 {offsets = [0, 384], sizes = [8, 128], strides = [1, 1]} : vector<8x512xf32> to vector<8x128xf32>
    %193 = math.tanh %192 : vector<8x128xf32>
    %194 = vector.extract_strided_slice %191 {offsets = [0, 0], sizes = [8, 128], strides = [1, 1]} : vector<8x384xf32> to vector<8x128xf32>
    %195 = vector.extract_strided_slice %191 {offsets = [0, 128], sizes = [8, 128], strides = [1, 1]} : vector<8x384xf32> to vector<8x128xf32>
    %196 = vector.extract_strided_slice %191 {offsets = [0, 256], sizes = [8, 128], strides = [1, 1]} : vector<8x384xf32> to vector<8x128xf32>
    %197 = arith.mulf %174, %194 : vector<8x128xf32>
    %198 = arith.mulf %193, %195 : vector<8x128xf32>
    %199 = arith.addf %197, %198 : vector<8x128xf32>
    %200 = math.tanh %199 : vector<8x128xf32>
    %201 = arith.mulf %196, %200 : vector<8x128xf32>
    %202 = arith.index_cast %c7_i32 : i32 to index
    %c0_52 = arith.constant 0 : index
    %c0_53 = arith.constant 0 : index
    %203 = vector.load %arg4[%202, %c0_52, %c0_53] : memref<8x8x128xf32, #tpu.memory_space<vmem>>, vector<1x8x128xf32>
    %204 = vector.shape_cast %203 : vector<1x8x128xf32> to vector<8x128xf32>
    %205 = vector.shape_cast %201 : vector<8x128xf32> to vector<1x8x128xf32>
    tpu.vector_store %arg4[%202, %c0_52, %c0_53], %205 {strides = array<i32>} : memref<8x8x128xf32, #tpu.memory_space<vmem>>, vector<1x8x128xf32>,
    %c8_i32 = arith.constant 8 : i32
    %c0_54 = arith.constant 0 : index
    %c0_55 = arith.constant 0 : index
    %206 = vector.load %arg9[%c0_54, %c0_55] : memref<8x128xf32, #tpu.memory_space<vmem>>, vector<8x128xf32>
    tpu.vector_store %arg9[%c0_54, %c0_55], %201 {strides = array<i32>} : memref<8x128xf32, #tpu.memory_space<vmem>>, vector<8x128xf32>,
    %c0_56 = arith.constant 0 : index
    %c0_57 = arith.constant 0 : index
    %207 = vector.load %arg10[%c0_56, %c0_57] : memref<8x128xf32, #tpu.memory_space<vmem>>, vector<8x128xf32>
    tpu.vector_store %arg10[%c0_56, %c0_57], %199 {strides = array<i32>} : memref<8x128xf32, #tpu.memory_space<vmem>>, vector<8x128xf32>,
    %c0_i32_58 = arith.constant 0 : i32
    %208 = arith.cmpi eq, %arg1, %c0_i32_58 : i32
    %209 = arith.extui %208 : i1 to i32
    %c0_i32_59 = arith.constant 0 : i32
    %210 = arith.cmpi ne, %209, %c0_i32_59 : i32
    scf.if %210 {
      %c0_60 = arith.constant 0 : index
      %c0_61 = arith.constant 0 : index
      %211 = vector.load %arg5[%c0_60, %c0_61] : memref<8x128xf32, #tpu.memory_space<vmem>>, vector<8x128xf32>
      tpu.vector_store %arg5[%c0_60, %c0_61], %201 {strides = array<i32>} : memref<8x128xf32, #tpu.memory_space<vmem>>, vector<8x128xf32>,
      %c0_62 = arith.constant 0 : index
      %c0_63 = arith.constant 0 : index
      %212 = vector.load %arg6[%c0_62, %c0_63] : memref<8x128xf32, #tpu.memory_space<vmem>>, vector<8x128xf32>
      tpu.vector_store %arg6[%c0_62, %c0_63], %199 {strides = array<i32>} : memref<8x128xf32, #tpu.memory_space<vmem>>, vector<8x128xf32>,
    } else {
    }
    return
  }
  func.func @transform_0(%arg0: i32, %arg1: i32) -> (i32, i32, i32) {
    %c0_i32 = arith.constant 0 : i32
    %c0_i32_0 = arith.constant 0 : i32
    return %arg1, %arg0, %c0_i32 : i32, i32, i32
  }
  func.func @transform_2(%arg0: i32, %arg1: i32) -> (i32, i32, i32) {
    %c0_i32 = arith.constant 0 : i32
    %c0_i32_0 = arith.constant 0 : i32
    return %arg1, %arg0, %c0_i32 : i32, i32, i32
  }
  func.func @transform_3(%arg0: i32, %arg1: i32) -> (i32, i32) {
    %c0_i32 = arith.constant 0 : i32
    %c0_i32_0 = arith.constant 0 : i32
    return %arg0, %c0_i32 : i32, i32
  }
  func.func @transform_4(%arg0: i32, %arg1: i32) -> (i32, i32) {
    %c0_i32 = arith.constant 0 : i32
    %c0_i32_0 = arith.constant 0 : i32
    return %arg0, %c0_i32 : i32, i32
  }
}

</mosaic_0001>

<bundles_post_ra>
// kernel: tpu_custom_call.1
= control target key start
LH: loop header
LB: loop body
LE: loop exit
PB: predicated region body
PF: predicated region fallthrough
CT: control target
= control target key end

     0   :  { %10 = vsyncpa [#allocation7], 0  ;;  %s2613_s0 = inlined_call_operand.hbm [shape: f32[8,8,512], index: 0, kind: input, shape index: {}]   ;;  %s2614_s1 = inlined_call_operand.hbm [shape: f32[128,512], index: 1, kind: input, shape index: {}]   ;;  %s2615_s2 = inlined_call_operand.hbm [shape: f32[8,8,128], index: 2, kind: output, shape index: {0}]   ;;  %s2616_s3 = inlined_call_operand.hbm [shape: f32[8,128], index: 3, kind: output, shape index: {1}]   ;;  %s2617_s4 = inlined_call_operand.hbm [shape: f32[8,128], index: 4, kind: output, shape index: {2}]  }
   0x1   :  { %11 = vsyncpa [#allocation8], 0 }
   0x2   :  { %12 = vsyncpa [#allocation11], 0  ;;  %s17_s17 = sshll.u32 %s2613_s0, 4  ;;  %s1767_s18 = smov [#allocation6]   ;;  %s18_s17 = int_to_ptr.hbm [resolvable:$true] %s17_s17 }
   0x3   :  { %s19_s19 = sshll.u32 %s1767_s18, 4  ;;  %s1768_s20 = smov 512   ;;  %s20_s19 = int_to_ptr.vmem [resolvable:$true] %s19_s19 }
   0x4   :  { %s1769_s21 = smov 32  }
   0x5   :  { %25 = dma.hbm_to_vmem [thread:$0]  %s18_s17, 4096, %s20_s19, [#allocation7], %s1768_s20, %s1768_s20, %s1769_s21  }
   0x6   :  { %1759 = dma.done.wait [#allocation7], 4096  }
   0x7   :  { %1760 = vsyncadd [#allocation7], 4294963200  ;;  %s41_s24 = sshll.u32 %s2614_s1, 4  ;;  %s1770_s25 = smov [#allocation2]   ;;  %s42_s24 = int_to_ptr.hbm [resolvable:$true] %s41_s24 }
   0x8   :  { %s43_s26 = sshll.u32 %s1770_s25, 4  ;;  %s44_s26 = int_to_ptr.vmem [resolvable:$true] %s43_s26 }
   0x9   :  { %46 = dma.hbm_to_vmem [thread:$0]  %s42_s24, 8192, %s44_s26, [#allocation3] }
   0xa   :  { %1761 = dma.done.wait [#allocation3], 8192 }
   0xb   :  { %1762 = vsyncadd [#allocation3], 4294959104  ;;  %v1808_v0 = vld [vmem:[#allocation2 + $0x1e0] sm:$0xff]  ;;  %v1810_v1 = vld [vmem:[#allocation2 + $0x1e8] sm:$0xff]  ;;  %v1771_v60 = vmov 0.0   ;;  %s1772_s0 = smov [#allocation9]  }
   0xc   :  { %2724 = vst [vmem:[#allocation21_spill] sm:$0xff] %v1808_v0  ;;  %v1812_v2 = vld [vmem:[#allocation2 + $0x1f0] sm:$0xff]  ;;  %123 = vmatpush.msra.mxu0 %v1808_v0  ;;  %143 = vmatpush.msra.mxu1 %v1810_v1  ;;  %v1816_v3 = vld [vmem:[#allocation2 + $0x1c0] sm:$0xff]  ;;  %v1818_v4 = vld [vmem:[#allocation2 + $0x1c8] sm:$0xff]  ;;  %s1360_s1 = sshll.u32 %s1772_s0, 4  ;;  %s1362_s29 = sshll.u32 %s2615_s2, 4  ;;  %s1361_s1 = int_to_ptr.vmem [resolvable:$true] %s1360_s1  ;;  %s1363_s29 = int_to_ptr.hbm [resolvable:$true] %s1362_s29 }
   0xd   :  { %v1820_v5 = vld [vmem:[#allocation2 + $0x1d0] sm:$0xff]  ;;  %163 = vmatpush.msra.mxu2 %v1812_v2  ;;  %v1823_v6 = vld [vmem:[#allocation2 + $0x1a0] sm:$0xff]  ;;  %v1825_v7 = vld [vmem:[#allocation2 + $0x1a8] sm:$0xff]  ;;  %s1773_s30 = smov [#allocation10]   ;;  %s1376_s8 = sshll.u32 %s2616_s3, 4  ;;  %s1377_s8 = int_to_ptr.hbm [resolvable:$true] %s1376_s8 }
   0xe   :  { %124 = vmatpush.msra.mxu0 %v1816_v3  ;;  %144 = vmatpush.msra.mxu1 %v1818_v4  ;;  %v1829_v8 = vld [vmem:[#allocation2 + $0x1b0] sm:$0xff]  ;;  %v1832_v9 = vld [vmem:[#allocation2 + $0x180] sm:$0xff]  ;;  %v1834_v10 = vld [vmem:[#allocation2 + $0x188] sm:$0xff]  ;;  %s1374_s5 = sshll.u32 %s1773_s30, 4  ;;  %s1774_s9 = smov [#allocation12]   ;;  %s1375_s5 = int_to_ptr.vmem [resolvable:$true] %s1374_s5 }
   0xf   :  { %164 = vmatpush.msra.mxu2 %v1820_v5  ;;  %v1838_v11 = vld [vmem:[#allocation2 + $0x190] sm:$0xff]  ;;  %v1841_v12 = vld [vmem:[#allocation2 + $0x160] sm:$0xff]  ;;  %v1843_v13 = vld [vmem:[#allocation2 + $0x168] sm:$0xff]  ;;  %s1385_s10 = sshll.u32 %s1774_s9, 4  ;;  %s1387_s13 = sshll.u32 %s2617_s4, 4  ;;  %s1386_s10 = int_to_ptr.vmem [resolvable:$true] %s1385_s10  ;;  %s1388_s13 = int_to_ptr.hbm [resolvable:$true] %s1387_s13 }
  0x10   :  { %125 = vmatpush.msra.mxu0 %v1823_v6  ;;  %145 = vmatpush.msra.mxu1 %v1825_v7  ;;  %v1847_v14 = vld [vmem:[#allocation2 + $0x170] sm:$0xff]  ;;  %v1850_v15 = vld [vmem:[#allocation2 + $0x140] sm:$0xff]  ;;  %v1852_v16 = vld [vmem:[#allocation2 + $0x148] sm:$0xff]  ;;  %s1775_s2 = smov 128   ;;  %s1776_s3 = smov 8  }
  0x11   :  { %165 = vmatpush.msra.mxu2 %v1829_v8  ;;  %v1854_v17 = vld [vmem:[#allocation2 + $0x1f8] sm:$0xff]  ;;  %v1858_v18 = vld [vmem:[#allocation2 + $0x150] sm:$0xff]  ;;  %v1863_v20 = vld [vmem:[#allocation2 + $0x120] sm:$0xff] }
  0x12   :  { %126 = vmatpush.msra.mxu0 %v1832_v9  ;;  %146 = vmatpush.msra.mxu1 %v1834_v10  ;;  %v1860_v19 = vld [vmem:[#allocation2 + $0x1d8] sm:$0xff]  ;;  %v1865_v21 = vld [vmem:[#allocation2 + $0x128] sm:$0xff]  ;;  %v1870_v22 = vld [vmem:[#allocation2 + $0x130] sm:$0xff] }
  0x13   :  { %166 = vmatpush.msra.mxu2 %v1838_v11  ;;  %183 = vmatpush.msra.mxu3 %v1854_v17  ;;  %v1872_v23 = vld [vmem:[#allocation2 + $0x1b8] sm:$0xff]  ;;  %v1875_v24 = vld [vmem:[#allocation2 + $0x100] sm:$0xff]  ;;  %v1877_v25 = vld [vmem:[#allocation2 + $0x108] sm:$0xff] }
  0x14   :  { %127 = vmatpush.msra.mxu0 %v1841_v12  ;;  %147 = vmatpush.msra.mxu1 %v1843_v13  ;;  %v1882_v26 = vld [vmem:[#allocation2 + $0x110] sm:$0xff]  ;;  %v1884_v27 = vld [vmem:[#allocation2 + $0x198] sm:$0xff]  ;;  %v1887_v28 = vld [vmem:[#allocation2 + $0xe0] sm:$0xff] }
  0x15   :  { %167 = vmatpush.msra.mxu2 %v1847_v14  ;;  %184 = vmatpush.msra.mxu3 %v1860_v19  ;;  %v1889_v29 = vld [vmem:[#allocation2 + $0xe8] sm:$0xff]  ;;  %v1894_v30 = vld [vmem:[#allocation2 + $0xf0] sm:$0xff]  ;;  %v1896_v31 = vld [vmem:[#allocation2 + $0x178] sm:$0xff] }
  0x16   :  { %128 = vmatpush.msra.mxu0 %v1850_v15  ;;  %148 = vmatpush.msra.mxu1 %v1852_v16  ;;  %v1899_v32 = vld [vmem:[#allocation2 + $0xc0] sm:$0xff]  ;;  %v1901_v33 = vld [vmem:[#allocation2 + $0xc8] sm:$0xff]  ;;  %v1906_v34 = vld [vmem:[#allocation2 + $0xd0] sm:$0xff] }
  0x17   :  { %168 = vmatpush.msra.mxu2 %v1858_v18  ;;  %185 = vmatpush.msra.mxu3 %v1872_v23  ;;  %2725 = vst [vmem:[#allocation22_spill] sm:$0xff] %v1906_v34  ;;  %v1908_v35 = vld [vmem:[#allocation2 + $0x158] sm:$0xff]  ;;  %v1911_v36 = vld [vmem:[#allocation2 + $0xa0] sm:$0xff]  ;;  %v1913_v37 = vld [vmem:[#allocation2 + $0xa8] sm:$0xff] }
  0x18   :  { %129 = vmatpush.msra.mxu0 %v1863_v20  ;;  %149 = vmatpush.msra.mxu1 %v1865_v21  ;;  %2726 = vst [vmem:[#allocation23_spill] sm:$0xff] %v1911_v36  ;;  %v1918_v38 = vld [vmem:[#allocation2 + $0xb0] sm:$0xff]  ;;  %v1920_v39 = vld [vmem:[#allocation2 + $0x138] sm:$0xff]  ;;  %v1923_v40 = vld [vmem:[#allocation2 + $0x80] sm:$0xff] }
  0x19   :  { %169 = vmatpush.msra.mxu2 %v1870_v22  ;;  %186 = vmatpush.msra.mxu3 %v1884_v27  ;;  %2727 = vst [vmem:[#allocation24_spill] sm:$0xff] %v1913_v37  ;;  %v1925_v41 = vld [vmem:[#allocation2 + $0x88] sm:$0xff]  ;;  %v1930_v42 = vld [vmem:[#allocation2 + $0x90] sm:$0xff]  ;;  %v1932_v43 = vld [vmem:[#allocation2 + $0x118] sm:$0xff] }
  0x1a   :  { %130 = vmatpush.msra.mxu0 %v1875_v24  ;;  %150 = vmatpush.msra.mxu1 %v1877_v25  ;;  %2728 = vst [vmem:[#allocation25_spill] sm:$0xff] %v1918_v38  ;;  %v1935_v44 = vld [vmem:[#allocation2 + $0x60] sm:$0xff]  ;;  %v1937_v45 = vld [vmem:[#allocation2 + $0x68] sm:$0xff]  ;;  %v1942_v46 = vld [vmem:[#allocation2 + $0x70] sm:$0xff] }
  0x1b   :  { %170 = vmatpush.msra.mxu2 %v1882_v26  ;;  %187 = vmatpush.msra.mxu3 %v1896_v31  ;;  %2729 = vst [vmem:[#allocation26_spill] sm:$0xff] %v1923_v40  ;;  %v1944_v47 = vld [vmem:[#allocation2 + $0xf8] sm:$0xff]  ;;  %v1947_v48 = vld [vmem:[#allocation2 + $0x40] sm:$0xff]  ;;  %v1949_v49 = vld [vmem:[#allocation2 + $0x48] sm:$0xff] }
  0x1c   :  { %131 = vmatpush.msra.mxu0 %v1887_v28  ;;  %151 = vmatpush.msra.mxu1 %v1889_v29  ;;  %2730 = vst [vmem:[#allocation27_spill] sm:$0xff] %v1925_v41  ;;  %v1954_v50 = vld [vmem:[#allocation2 + $0x50] sm:$0xff]  ;;  %v1956_v51 = vld [vmem:[#allocation2 + $0xd8] sm:$0xff]  ;;  %v1959_v52 = vld [vmem:[#allocation2 + $0x20] sm:$0xff] }
  0x1d   :  { %171 = vmatpush.msra.mxu2 %v1894_v30  ;;  %188 = vmatpush.msra.mxu3 %v1908_v35  ;;  %2731 = vst [vmem:[#allocation28_spill] sm:$0xff] %v1930_v42  ;;  %v1961_v53 = vld [vmem:[#allocation2 + $0x28] sm:$0xff]  ;;  %v1966_v54 = vld [vmem:[#allocation2 + $0x30] sm:$0xff]  ;;  %v1968_v55 = vld [vmem:[#allocation2 + $0xb8] sm:$0xff] }
  0x1e   :  { %132 = vmatpush.msra.mxu0 %v1899_v32  ;;  %152 = vmatpush.msra.mxu1 %v1901_v33  ;;  %2732 = vst [vmem:[#allocation29_spill] sm:$0xff] %v1935_v44  ;;  %v1971_v56 = vld [vmem:[#allocation2] sm:$0xff]  ;;  %v1973_v57 = vld [vmem:[#allocation2 + $0x8] sm:$0xff]  ;;  %v1978_v58 = vld [vmem:[#allocation2 + $0x10] sm:$0xff] }
  0x1f   :  { %172 = vmatpush.msra.mxu2 %v1906_v34  ;;  %2733 = vst [vmem:[#allocation30_spill] sm:$0xff] %v1937_v45  ;;  %189 = vmatpush.msra.mxu3 %v1920_v39  ;;  %v1984_v59 = vld [vmem:[#allocation2 + $0x98] sm:$0xff] }
  0x20   :  { %133 = vmatpush.msra.mxu0 %v1911_v36  ;;  %153 = vmatpush.msra.mxu1 %v1913_v37  ;;  %2734 = vst [vmem:[#allocation31_spill] sm:$0xff] %v1942_v46  ;;  %v1987_v61 = vld [vmem:[#allocation2 + $0x78] sm:$0xff] }
  0x21   :  { %173 = vmatpush.msra.mxu2 %v1918_v38  ;;  %2735 = vst [vmem:[#allocation32_spill] sm:$0xff] %v1947_v48  ;;  %190 = vmatpush.msra.mxu3 %v1932_v43  ;;  %v1991_v62 = vld [vmem:[#allocation2 + $0x58] sm:$0xff] }
  0x22   :  { %134 = vmatpush.msra.mxu0 %v1923_v40  ;;  %154 = vmatpush.msra.mxu1 %v1925_v41  ;;  %2736 = vst [vmem:[#allocation33_spill] sm:$0xff] %v1949_v49  ;;  %v1997_v63 = vld [vmem:[#allocation2 + $0x38] sm:$0xff] }
  0x23   :  { %174 = vmatpush.msra.mxu2 %v1930_v42  ;;  %2737 = vst [vmem:[#allocation34_spill] sm:$0xff] %v1954_v50  ;;  %191 = vmatpush.msra.mxu3 %v1944_v47 }
  0x24   :  { %135 = vmatpush.msra.mxu0 %v1935_v44  ;;  %155 = vmatpush.msra.mxu1 %v1937_v45  ;;  %2738 = vst [vmem:[#allocation35_spill] sm:$0xff] %v1956_v51 }
  0x25   :  { %175 = vmatpush.msra.mxu2 %v1942_v46  ;;  %2739 = vst [vmem:[#allocation36_spill] sm:$0xff] %v1959_v52  ;;  %192 = vmatpush.msra.mxu3 %v1956_v51 }
  0x26   :  { %2740 = vst [vmem:[#allocation37_spill] sm:$0xff] %v1961_v53  ;;  %136 = vmatpush.msra.mxu0 %v1947_v48  ;;  %156 = vmatpush.msra.mxu1 %v1949_v49 }
  0x27   :  { %2741 = vst [vmem:[#allocation38_spill] sm:$0xff] %v1966_v54  ;;  %176 = vmatpush.msra.mxu2 %v1954_v50  ;;  %193 = vmatpush.msra.mxu3 %v1968_v55 }
  0x28   :  { %2742 = vst [vmem:[#allocation39_spill] sm:$0xff] %v1968_v55  ;;  %137 = vmatpush.msra.mxu0 %v1959_v52  ;;  %157 = vmatpush.msra.mxu1 %v1961_v53 }
  0x29   :  { %2743 = vst [vmem:[#allocation40_spill] sm:$0xff] %v1971_v56  ;;  %177 = vmatpush.msra.mxu2 %v1966_v54  ;;  %194 = vmatpush.msra.mxu3 %v1984_v59 }
  0x2a   :  { %2744 = vst [vmem:[#allocation41_spill] sm:$0xff] %v1973_v57  ;;  %138 = vmatpush.msra.mxu0 %v1971_v56  ;;  %158 = vmatpush.msra.mxu1 %v1973_v57 }
  0x2b   :  { %2745 = vst [vmem:[#allocation42_spill] sm:$0xff] %v1978_v58  ;;  %178 = vmatpush.msra.mxu2 %v1978_v58  ;;  %139 = vmatmul.f32.vlgmr.msra.gmra.mxu0 %v1771_v60 }
  0x2c   :  { %2746 = vst [vmem:[#allocation43_spill] sm:$0xff] %v1984_v59  ;;  %159 = vmatmul.f32.vlgmr.msra.gmra.mxu1 %v1771_v60  ;;  %179 = vmatmul.f32.vlgmr.msra.gmra.mxu2 %v1771_v60 }
  0x2d   :  { %2747 = vst [vmem:[#allocation44_spill] sm:$0xff] %v1987_v61  ;;  %276 = vmatpush.msrb.mxu0 %v1808_v0  ;;  %296 = vmatpush.msrb.mxu1 %v1810_v1  ;;  %v2003_v0 = vld [vmem:[#allocation2 + $0x18] sm:$0xff] }
  0x2e   :  { %2748 = vst [vmem:[#allocation45_spill] sm:$0xff] %v1991_v62  ;;  %316 = vmatpush.msrb.mxu2 %v1812_v2  ;;  %195 = vmatpush.msra.mxu3 %v1987_v61 }
  0x2f   :  { %277 = vmatpush.msrb.mxu0 %v1816_v3  ;;  %2749 = vst [vmem:[#allocation46_spill] sm:$0xff] %v1997_v63  ;;  %297 = vmatpush.msrb.mxu1 %v1818_v4 }
  0x30   :  { %317 = vmatpush.msrb.mxu2 %v1820_v5  ;;  %196 = vmatpush.msra.mxu3 %v1991_v62  ;;  %2750 = vst [vmem:[#allocation47_spill] sm:$0xff] %v2003_v0 }
  0x31   :  { %278 = vmatpush.msrb.mxu0 %v1823_v6  ;;  %298 = vmatpush.msrb.mxu1 %v1825_v7 }
  0x32   :  { %318 = vmatpush.msrb.mxu2 %v1829_v8  ;;  %197 = vmatpush.msra.mxu3 %v1997_v63 }
  0x33   :  { %279 = vmatpush.msrb.mxu0 %v1832_v9  ;;  %299 = vmatpush.msrb.mxu1 %v1834_v10 }
  0x34   :  { %319 = vmatpush.msrb.mxu2 %v1838_v11  ;;  %198 = vmatpush.msra.mxu3 %v2003_v0 }
  0x35   :  { %280 = vmatpush.msrb.mxu0 %v1841_v12  ;;  %199 = vmatmul.f32.vlgmr.msra.gmra.mxu3 %v1771_v60  ;;  %v2751_v60 = vld [vmem:[#allocation21_spill] sm:$0xff] }
  0x36   :  { %300 = vmatpush.msrb.mxu1 %v1843_v13  ;;  %336 = vmatpush.msrb.mxu3 %v1854_v17 }
  0x37   :  { %320 = vmatpush.msrb.mxu2 %v1847_v14  ;;  %281 = vmatpush.msrb.mxu0 %v1850_v15 }
  0x38   :  { %301 = vmatpush.msrb.mxu1 %v1852_v16  ;;  %337 = vmatpush.msrb.mxu3 %v1860_v19 }
  0x39   :  { %321 = vmatpush.msrb.mxu2 %v1858_v18  ;;  %282 = vmatpush.msrb.mxu0 %v1863_v20 }
  0x3a   :  { %302 = vmatpush.msrb.mxu1 %v1865_v21  ;;  %338 = vmatpush.msrb.mxu3 %v1872_v23 }
  0x3b   :  { %322 = vmatpush.msrb.mxu2 %v1870_v22  ;;  %283 = vmatpush.msrb.mxu0 %v1875_v24 }
  0x3c   :  { %303 = vmatpush.msrb.mxu1 %v1877_v25  ;;  %339 = vmatpush.msrb.mxu3 %v1884_v27 }
  0x3d   :  { %323 = vmatpush.msrb.mxu2 %v1882_v26  ;;  %284 = vmatpush.msrb.mxu0 %v1887_v28 }
  0x3e   :  { %304 = vmatpush.msrb.mxu1 %v1889_v29  ;;  %340 = vmatpush.msrb.mxu3 %v1896_v31 }
  0x3f   :  { %324 = vmatpush.msrb.mxu2 %v1894_v30  ;;  %285 = vmatpush.msrb.mxu0 %v1899_v32 }
  0x40   :  { %305 = vmatpush.msrb.mxu1 %v1901_v33  ;;  %341 = vmatpush.msrb.mxu3 %v1908_v35 }
  0x41   :  { %325 = vmatpush.msrb.mxu2 %v1906_v34  ;;  %286 = vmatpush.msrb.mxu0 %v1911_v36 }
  0x42   :  { %306 = vmatpush.msrb.mxu1 %v1913_v37  ;;  %342 = vmatpush.msrb.mxu3 %v1920_v39 }
  0x43   :  { %326 = vmatpush.msrb.mxu2 %v1918_v38  ;;  %287 = vmatpush.msrb.mxu0 %v1923_v40 }
  0x44   :  { %307 = vmatpush.msrb.mxu1 %v1925_v41  ;;  %343 = vmatpush.msrb.mxu3 %v1932_v43 }
  0x45   :  { %327 = vmatpush.msrb.mxu2 %v1930_v42  ;;  %288 = vmatpush.msrb.mxu0 %v1935_v44 }
  0x46   :  { %308 = vmatpush.msrb.mxu1 %v1937_v45  ;;  %344 = vmatpush.msrb.mxu3 %v1944_v47 }
  0x47   :  { %328 = vmatpush.msrb.mxu2 %v1942_v46  ;;  %289 = vmatpush.msrb.mxu0 %v1947_v48 }
  0x48   :  { %309 = vmatpush.msrb.mxu1 %v1949_v49  ;;  %345 = vmatpush.msrb.mxu3 %v1956_v51 }
  0x49   :  { %329 = vmatpush.msrb.mxu2 %v1954_v50  ;;  %290 = vmatpush.msrb.mxu0 %v1959_v52 }
  0x4a   :  { %310 = vmatpush.msrb.mxu1 %v1961_v53  ;;  %346 = vmatpush.msrb.mxu3 %v1968_v55 }
  0x4b   :  { %330 = vmatpush.msrb.mxu2 %v1966_v54  ;;  %291 = vmatpush.msrb.mxu0 %v1971_v56 }
  0x4c   :  { %311 = vmatpush.msrb.mxu1 %v1973_v57  ;;  %347 = vmatpush.msrb.mxu3 %v1984_v59 }
  0x4d   :  { %331 = vmatpush.msrb.mxu2 %v1978_v58  ;;  %430 = vmatpush.msra.mxu0 %v2751_v60 }
  0x4e   :  { %450 = vmatpush.msra.mxu1 %v1810_v1  ;;  %348 = vmatpush.msrb.mxu3 %v1987_v61 }
  0x4f   :  { %470 = vmatpush.msra.mxu2 %v1812_v2  ;;  %431 = vmatpush.msra.mxu0 %v1816_v3 }
  0x50   :  { %451 = vmatpush.msra.mxu1 %v1818_v4  ;;  %349 = vmatpush.msrb.mxu3 %v1991_v62 }
  0x51   :  { %471 = vmatpush.msra.mxu2 %v1820_v5  ;;  %432 = vmatpush.msra.mxu0 %v1823_v6 }
  0x52   :  { %452 = vmatpush.msra.mxu1 %v1825_v7  ;;  %350 = vmatpush.msrb.mxu3 %v1997_v63 }
  0x53   :  { %472 = vmatpush.msra.mxu2 %v1829_v8  ;;  %433 = vmatpush.msra.mxu0 %v1832_v9 }
  0x54   :  { %453 = vmatpush.msra.mxu1 %v1834_v10  ;;  %351 = vmatpush.msrb.mxu3 %v2003_v0 }
  0x55   :  { %473 = vmatpush.msra.mxu2 %v1838_v11  ;;  %434 = vmatpush.msra.mxu0 %v1841_v12 }
  0x56   :  { %490 = vmatpush.msra.mxu3 %v1854_v17  ;;  %454 = vmatpush.msra.mxu1 %v1843_v13 }
  0x57   :  { %474 = vmatpush.msra.mxu2 %v1847_v14  ;;  %435 = vmatpush.msra.mxu0 %v1850_v15 }
  0x58   :  { %491 = vmatpush.msra.mxu3 %v1860_v19  ;;  %455 = vmatpush.msra.mxu1 %v1852_v16 }
  0x59   :  { %475 = vmatpush.msra.mxu2 %v1858_v18  ;;  %436 = vmatpush.msra.mxu0 %v1863_v20 }
  0x5a   :  { %492 = vmatpush.msra.mxu3 %v1872_v23  ;;  %456 = vmatpush.msra.mxu1 %v1865_v21 }
  0x5b   :  { %476 = vmatpush.msra.mxu2 %v1870_v22  ;;  %437 = vmatpush.msra.mxu0 %v1875_v24 }
  0x5c   :  { %493 = vmatpush.msra.mxu3 %v1884_v27  ;;  %457 = vmatpush.msra.mxu1 %v1877_v25 }
  0x5d   :  { %477 = vmatpush.msra.mxu2 %v1882_v26  ;;  %438 = vmatpush.msra.mxu0 %v1887_v28 }
  0x5e   :  { %494 = vmatpush.msra.mxu3 %v1896_v31  ;;  %458 = vmatpush.msra.mxu1 %v1889_v29 }
  0x5f   :  { %478 = vmatpush.msra.mxu2 %v1894_v30  ;;  %439 = vmatpush.msra.mxu0 %v1899_v32 }
  0x60   :  { %495 = vmatpush.msra.mxu3 %v1908_v35  ;;  %459 = vmatpush.msra.mxu1 %v1901_v33 }
  0x61   :  { %479 = vmatpush.msra.mxu2 %v1906_v34  ;;  %440 = vmatpush.msra.mxu0 %v1911_v36 }
  0x62   :  { %496 = vmatpush.msra.mxu3 %v1920_v39  ;;  %460 = vmatpush.msra.mxu1 %v1913_v37 }
  0x63   :  { %480 = vmatpush.msra.mxu2 %v1918_v38  ;;  %441 = vmatpush.msra.mxu0 %v1923_v40 }
  0x64   :  { %497 = vmatpush.msra.mxu3 %v1932_v43  ;;  %461 = vmatpush.msra.mxu1 %v1925_v41 }
  0x65   :  { %481 = vmatpush.msra.mxu2 %v1930_v42  ;;  %442 = vmatpush.msra.mxu0 %v1935_v44 }
  0x66   :  { %498 = vmatpush.msra.mxu3 %v1944_v47  ;;  %462 = vmatpush.msra.mxu1 %v1937_v45 }
  0x67   :  { %482 = vmatpush.msra.mxu2 %v1942_v46  ;;  %443 = vmatpush.msra.mxu0 %v1947_v48 }
  0x68   :  { %499 = vmatpush.msra.mxu3 %v1956_v51  ;;  %463 = vmatpush.msra.mxu1 %v1949_v49 }
  0x69   :  { %483 = vmatpush.msra.mxu2 %v1954_v50  ;;  %444 = vmatpush.msra.mxu0 %v1959_v52  ;;  %v119_v52 = vld [vmem:[#allocation6] sm:$0xff] }
  0x6a   :  { %500 = vmatpush.msra.mxu3 %v1968_v55  ;;  %464 = vmatpush.msra.mxu1 %v1961_v53  ;;  %v120_v53 = vld [vmem:[#allocation6 + $0x8] sm:$0xff] }
  0x6b   :  { %484 = vmatpush.msra.mxu2 %v1966_v54  ;;  %445 = vmatpush.msra.mxu0 %v1971_v56 }
  0x6c   :  { %501 = vmatpush.msra.mxu3 %v1984_v59  ;;  %465 = vmatpush.msra.mxu1 %v1973_v57  ;;  %v121_v57 = vld [vmem:[#allocation6 + $0x10] sm:$0xff] }
  0x6d   :  { %485 = vmatpush.msra.mxu2 %v1978_v58 }
  0x6e   :  { %502 = vmatpush.msra.mxu3 %v1987_v61 }
  0x70   :  { %503 = vmatpush.msra.mxu3 %v1991_v62 }
  0x72   :  { %504 = vmatpush.msra.mxu3 %v1997_v63 }
  0x74   :  { %505 = vmatpush.msra.mxu3 %v2003_v0  ;;  %v122_v0 = vld [vmem:[#allocation6 + $0x18] sm:$0xff] }
  0xa8   :  { %v140_v50 = vpop.f32.mrf.mxu0 }
  0xa9   :  { %v203_v54 = vadd.f32 %v140_v50, %v119_v52  ;;  %v160_v49 = vpop.f32.mrf.mxu1 }
  0xaa   :  { %v204_v48 = vadd.f32 %v160_v49, %v120_v53 }
  0xab   :  { %v1412_v46 = vmul.f32 -1.442695, %v203_v54 }
  0xac   :  { %v1413_v56 = vmul.f32 -1.442695, %v204_v48 }
  0xad   :  { %1447 = vpow2.f32 %v1412_v46 }
  0xae   :  { %1449 = vpow2.f32 %v1413_v56 }
  0xaf   :  { %v180_v58 = vpop.f32.mrf.mxu2 }
  0xb0   :  { %v205_v45 = vadd.f32 %v180_v58, %v121_v57 }
  0xb2   :  { %v1414_v61 = vmul.f32 -1.442695, %v205_v45 }
  0xb3   :  { %v1448_v44 = vpop.eup %1447 }
  0xb4   :  { %v1450_v62 = vpop.eup %1449  ;;  %v216_v59 = vadd.f32 1.0, %v1448_v44  ;;  %1451 = vpow2.f32 %v1414_v61 }
  0xb5   :  { %v217_v63 = vadd.f32 1.0, %v1450_v62 }
  0xb6   :  { %1453 = vrcp.f32 %v216_v59  ;;  %v230_v45 = vand.u32 2147483648, %v216_v59  ;;  %v228_v44 = vand.u32 2147483647, %v216_v59  ;;  %vm224_vm2 = vweird.f32 %v216_v59 }
  0xb7   :  { %1455 = vrcp.f32 %v217_v63  ;;  %v245_v61 = vand.u32 2147483648, %v217_v63  ;;  %v243_v41 = vand.u32 2147483647, %v217_v63  ;;  %vm239_vm4 = vweird.f32 %v217_v63 }
  0xb8   :  { %v200_v42 = vpop.f32.mrf.mxu3  ;;  %vm229_vm5 = vcmp.eq.f32.partialorder %v228_v44, 8.507059e+37 }
  0xb9   :  { %v206_v49 = vadd.f32 %v200_v42, %v122_v0  ;;  %v231_v0 = vor.u32 1.1754944e-38, %v230_v45  ;;  %vm244_vm7 = vcmp.eq.f32.partialorder %v243_v41, 8.507059e+37 }
  0xba   :  { %v1452_v50 = vpop.eup %1451 }
  0xbb   :  { %v218_v52 = vadd.f32 1.0, %v1452_v50 }
  0xbc   :  { %v1454_v53 = vpop.eup %1453 }
  0xbd   :  { %v1456_v48 = vpop.eup %1455  ;;  %v220_v46 = vmul.f32 %v1454_v53, %v216_v59  ;;  %1457 = vrcp.f32 %v218_v52  ;;  %vm225_vm0 = vweird.f32 %v1454_v53  ;;  %vm254_vm9 = vweird.f32 %v218_v52 }
  0xbe   :  { %v235_v54 = vmul.f32 %v1456_v48, %v217_v63  ;;  %1459 = vtanh.f32 %v206_v49  ;;  %vm240_vm1 = vweird.f32 %v1456_v48  ;;  %vm226_vm3 = vmor %vm224_vm2, %vm225_vm0  ;;  %v246_v49 = vor.u32 1.1754944e-38, %v245_v61 }
  0xbf   :  { %v221_v56 = vsub.f32 1.0, %v220_v46  ;;  %vm241_vm6 = vmor %vm239_vm4, %vm240_vm1  ;;  %v258_v63 = vand.u32 2147483647, %v218_v52 }
  0xc0   :  { %v236_v57 = vsub.f32 1.0, %v235_v54 }
  0xc1   :  { %v222_v58 = vmul.f32 %v1454_v53, %v221_v56  ;;  %vm259_vm11 = vcmp.eq.f32.partialorder %v258_v63, 8.507059e+37  ;;  %v2771_v63 = vld [vmem:[#allocation37_spill] sm:$0xff] }
  0xc2   :  { %v237_v62 = vmul.f32 %v1456_v48, %v236_v57 }
  0xc3   :  { %v1458_v40 = vpop.eup %1457  ;;  %v223_v50 = vadd.f32 %v1454_v53, %v222_v58  ;;  %v260_v58 = vand.u32 2147483648, %v218_v52 }
  0xc4   :  { %v250_v42 = vmul.f32 %v1458_v40, %v218_v52  ;;  %v238_v55 = vadd.f32 %v1456_v48, %v237_v62  ;;  %v1460_v38 = vpop.eup %1459  ;;  %vm255_vm8 = vweird.f32 %v1458_v40  ;;  %v2758_v52 = vld [vmem:[#allocation26_spill] sm:$0xff]  ;;  %v2760_v62 = vld [vmem:[#allocation28_spill] sm:$0xff] }
  0xc5   :  { %v227_v46 = vsel %vm226_vm3, %v1454_v53, %v223_v50  ;;  %vm256_vm10 = vmor %vm254_vm9, %vm255_vm8  ;;  %v261_v44 = vor.u32 1.1754944e-38, %v260_v58  ;;  %v2761_v50 = vld [vmem:[#allocation43_spill] sm:$0xff]  ;;  %v2770_v58 = vld [vmem:[#allocation36_spill] sm:$0xff] }
  0xc6   :  { %v251_v54 = vsub.f32 1.0, %v250_v42  ;;  %v232_v56 = vsel %vm229_vm5, %v231_v0, %v227_v46  ;;  %v242_v37 = vsel %vm241_vm6, %v1456_v48, %v238_v55  ;;  %v2759_v48 = vld [vmem:[#allocation27_spill] sm:$0xff]  ;;  %v2762_v0 = vld [vmem:[#allocation29_spill] sm:$0xff]  ;;  %v2763_v42 = vld [vmem:[#allocation30_spill] sm:$0xff] }
  0xc7   :  { %v247_v57 = vsel %vm244_vm7, %v246_v49, %v242_v37  ;;  %v265_v36 = vmul.f32 0.0, %v232_v56  ;;  %v2754_v37 = vld [vmem:[#allocation23_spill] sm:$0xff]  ;;  %v2765_v49 = vld [vmem:[#allocation44_spill] sm:$0xff]  ;;  %v2767_v56 = vld [vmem:[#allocation33_spill] sm:$0xff] }
  0xc8   :  { %v252_v51 = vmul.f32 %v1458_v40, %v251_v54  ;;  %v266_v34 = vmul.f32 %v1460_v38, %v247_v57  ;;  %v2755_v38 = vld [vmem:[#allocation24_spill] sm:$0xff]  ;;  %v2764_v46 = vld [vmem:[#allocation31_spill] sm:$0xff]  ;;  %v2768_v57 = vld [vmem:[#allocation34_spill] sm:$0xff] }
  0xc9   :  { %v2766_v54 = vld [vmem:[#allocation32_spill] sm:$0xff] }
  0xca   :  { %v2128_v59 = vadd.f32 %v266_v34, %v265_v36  ;;  %v253_v45 = vadd.f32 %v1458_v40, %v252_v51  ;;  %v2752_v34 = vld [vmem:[#allocation22_spill] sm:$0xff]  ;;  %v2753_v36 = vld [vmem:[#allocation35_spill] sm:$0xff] }
  0xcb   :  { %v2757_v51 = vld [vmem:[#allocation39_spill] sm:$0xff] }
  0xcc   :  { %1461 = vtanh.f32 %v2128_v59  ;;  %v257_v53 = vsel %vm256_vm10, %v1458_v40, %v253_v45  ;;  %v2756_v40 = vld [vmem:[#allocation25_spill] sm:$0xff] }
  0xcd   :  { %v262_v55 = vsel %vm259_vm11, %v261_v44, %v257_v53  ;;  %v2769_v45 = vld [vmem:[#allocation45_spill] sm:$0xff]  ;;  %v2772_v53 = vld [vmem:[#allocation38_spill] sm:$0xff] }
  0xce   :  { %v2773_v44 = vld [vmem:[#allocation46_spill] sm:$0xff] }
  0xd2   :  { %v1462_v61 = vpop.eup %1461 }
  0xd3   :  { %v269_v41 = vmul.f32 %v1462_v61, %v262_v55  ;;  %v2774_v61 = vld [vmem:[#allocation40_spill] sm:$0xff]  ;;  %v2775_v55 = vld [vmem:[#allocation41_spill] sm:$0xff] }
  0xd5   :  { %270 = vst [vmem:[#allocation9] sm:$0xff] %v269_v41  ;;  %292 = vmatmul.f32.vlgmr.msrb.gmra.mxu0 %v269_v41  ;;  %312 = vmatmul.f32.vlgmr.msrb.gmra.mxu1 %v269_v41 }
  0xd6   :  { %332 = vmatmul.f32.vlgmr.msrb.gmra.mxu2 %v269_v41  ;;  %352 = vmatmul.f32.vlgmr.msrb.gmra.mxu3 %v269_v41  ;;  %v2776_v41 = vld [vmem:[#allocation42_spill] sm:$0xff] }
  0xd7   :  { %584 = vmatpush.msrb.mxu0 %v2751_v60  ;;  %604 = vmatpush.msrb.mxu1 %v1810_v1 }
  0xd8   :  { %624 = vmatpush.msrb.mxu2 %v1812_v2  ;;  %644 = vmatpush.msrb.mxu3 %v1854_v17 }
  0xd9   :  { %585 = vmatpush.msrb.mxu0 %v1816_v3  ;;  %605 = vmatpush.msrb.mxu1 %v1818_v4 }
  0xda   :  { %625 = vmatpush.msrb.mxu2 %v1820_v5  ;;  %645 = vmatpush.msrb.mxu3 %v1860_v19 }
  0xdb   :  { %586 = vmatpush.msrb.mxu0 %v1823_v6  ;;  %606 = vmatpush.msrb.mxu1 %v1825_v7 }
  0xdc   :  { %626 = vmatpush.msrb.mxu2 %v1829_v8  ;;  %646 = vmatpush.msrb.mxu3 %v1872_v23 }
  0xdd   :  { %587 = vmatpush.msrb.mxu0 %v1832_v9  ;;  %607 = vmatpush.msrb.mxu1 %v1834_v10 }
  0xde   :  { %627 = vmatpush.msrb.mxu2 %v1838_v11  ;;  %647 = vmatpush.msrb.mxu3 %v1884_v27 }
  0xdf   :  { %588 = vmatpush.msrb.mxu0 %v1841_v12  ;;  %608 = vmatpush.msrb.mxu1 %v1843_v13 }
  0xe0   :  { %628 = vmatpush.msrb.mxu2 %v1847_v14  ;;  %648 = vmatpush.msrb.mxu3 %v1896_v31 }
  0xe1   :  { %589 = vmatpush.msrb.mxu0 %v1850_v15  ;;  %609 = vmatpush.msrb.mxu1 %v1852_v16 }
  0xe2   :  { %629 = vmatpush.msrb.mxu2 %v1858_v18  ;;  %649 = vmatpush.msrb.mxu3 %v1908_v35 }
  0xe3   :  { %590 = vmatpush.msrb.mxu0 %v1863_v20  ;;  %610 = vmatpush.msrb.mxu1 %v1865_v21 }
  0xe4   :  { %630 = vmatpush.msrb.mxu2 %v1870_v22  ;;  %650 = vmatpush.msrb.mxu3 %v1920_v39 }
  0xe5   :  { %591 = vmatpush.msrb.mxu0 %v1875_v24  ;;  %611 = vmatpush.msrb.mxu1 %v1877_v25 }
  0xe6   :  { %631 = vmatpush.msrb.mxu2 %v1882_v26  ;;  %651 = vmatpush.msrb.mxu3 %v1932_v43 }
  0xe7   :  { %592 = vmatpush.msrb.mxu0 %v1887_v28  ;;  %612 = vmatpush.msrb.mxu1 %v1889_v29 }
  0xe8   :  { %632 = vmatpush.msrb.mxu2 %v1894_v30  ;;  %652 = vmatpush.msrb.mxu3 %v1944_v47 }
  0xe9   :  { %593 = vmatpush.msrb.mxu0 %v1899_v32  ;;  %613 = vmatpush.msrb.mxu1 %v1901_v33 }
  0xea   :  { %633 = vmatpush.msrb.mxu2 %v2752_v34  ;;  %653 = vmatpush.msrb.mxu3 %v2753_v36 }
  0xeb   :  { %594 = vmatpush.msrb.mxu0 %v2754_v37  ;;  %614 = vmatpush.msrb.mxu1 %v2755_v38 }
  0xec   :  { %634 = vmatpush.msrb.mxu2 %v2756_v40  ;;  %654 = vmatpush.msrb.mxu3 %v2757_v51 }
  0xed   :  { %595 = vmatpush.msrb.mxu0 %v2758_v52  ;;  %615 = vmatpush.msrb.mxu1 %v2759_v48 }
  0xee   :  { %635 = vmatpush.msrb.mxu2 %v2760_v62  ;;  %655 = vmatpush.msrb.mxu3 %v2761_v50 }
  0xef   :  { %596 = vmatpush.msrb.mxu0 %v2762_v0  ;;  %616 = vmatpush.msrb.mxu1 %v2763_v42 }
  0xf0   :  { %636 = vmatpush.msrb.mxu2 %v2764_v46  ;;  %656 = vmatpush.msrb.mxu3 %v2765_v49 }
  0xf1   :  { %597 = vmatpush.msrb.mxu0 %v2766_v54  ;;  %617 = vmatpush.msrb.mxu1 %v2767_v56  ;;  %v2777_v54 = vld [vmem:[#allocation47_spill] sm:$0xff] }
  0xf2   :  { %637 = vmatpush.msrb.mxu2 %v2768_v57  ;;  %657 = vmatpush.msrb.mxu3 %v2769_v45  ;;  %v272_v56 = vld [vmem:[#allocation6 + $0x20] sm:$0xff]  ;;  %v273_v57 = vld [vmem:[#allocation6 + $0x28] sm:$0xff] }
  0xf3   :  { %598 = vmatpush.msrb.mxu0 %v2770_v58  ;;  %618 = vmatpush.msrb.mxu1 %v2771_v63 }
  0xf4   :  { %638 = vmatpush.msrb.mxu2 %v2772_v53  ;;  %658 = vmatpush.msrb.mxu3 %v2773_v44  ;;  %v274_v53 = vld [vmem:[#allocation6 + $0x30] sm:$0xff] }
  0xf5   :  { %599 = vmatpush.msrb.mxu0 %v2774_v61  ;;  %619 = vmatpush.msrb.mxu1 %v2775_v55 }
  0xf6   :  { %639 = vmatpush.msrb.mxu2 %v2776_v41  ;;  %659 = vmatpush.msrb.mxu3 %v2777_v54  ;;  %v275_v54 = vld [vmem:[#allocation6 + $0x38] sm:$0xff] }
 0x152   :  { %v293_v49 = vpop.f32.mrf.mxu0  ;;  %v313_v45 = vpop.f32.mrf.mxu1 }
 0x153   :  { %v356_v46 = vadd.f32 %v293_v49, %v272_v56  ;;  %v357_v58 = vadd.f32 %v313_v45, %v273_v57 }
 0x155   :  { %v1415_v42 = vmul.f32 -1.442695, %v356_v46  ;;  %v1416_v63 = vmul.f32 -1.442695, %v357_v58 }
 0x157   :  { %1463 = vpow2.f32 %v1415_v42 }
 0x158   :  { %1465 = vpow2.f32 %v1416_v63 }
 0x159   :  { %v333_v44 = vpop.f32.mrf.mxu2  ;;  %v353_v48 = vpop.f32.mrf.mxu3 }
 0x15a   :  { %v358_v0 = vadd.f32 %v333_v44, %v274_v53  ;;  %v359_v46 = vadd.f32 %v353_v48, %v275_v54 }
 0x15c   :  { %v1417_v61 = vmul.f32 -1.442695, %v358_v0 }
 0x15d   :  { %v1464_v50 = vpop.eup %1463 }
 0x15e   :  { %v1466_v55 = vpop.eup %1465  ;;  %v369_v62 = vadd.f32 1.0, %v1464_v50  ;;  %1467 = vpow2.f32 %v1417_v61 }
 0x15f   :  { %v370_v41 = vadd.f32 1.0, %v1466_v55 }
 0x160   :  { %1469 = vrcp.f32 %v369_v62  ;;  %v383_v63 = vand.u32 2147483648, %v369_v62  ;;  %v381_v50 = vand.u32 2147483647, %v369_v62  ;;  %vm377_vm14 = vweird.f32 %v369_v62 }
 0x161   :  { %1471 = vrcp.f32 %v370_v41  ;;  %v398_v44 = vand.u32 2147483648, %v370_v41  ;;  %v396_v55 = vand.u32 2147483647, %v370_v41  ;;  %vm392_vm0 = vweird.f32 %v370_v41 }
 0x162   :  { %v384_v48 = vor.u32 1.1754944e-38, %v383_v63  ;;  %vm382_vm1 = vcmp.eq.f32.partialorder %v381_v50, 8.507059e+37 }
 0x163   :  { %vm397_vm3 = vcmp.eq.f32.partialorder %v396_v55, 8.507059e+37 }
 0x164   :  { %v1468_v52 = vpop.eup %1467 }
 0x165   :  { %v371_v49 = vadd.f32 1.0, %v1468_v52 }
 0x166   :  { %v1470_v56 = vpop.eup %1469 }
 0x167   :  { %v1472_v57 = vpop.eup %1471  ;;  %v373_v42 = vmul.f32 %v1470_v56, %v369_v62  ;;  %1473 = vrcp.f32 %v371_v49  ;;  %vm378_vm12 = vweird.f32 %v1470_v56  ;;  %vm407_vm5 = vweird.f32 %v371_v49 }
 0x168   :  { %v388_v45 = vmul.f32 %v1472_v57, %v370_v41  ;;  %1475 = vtanh.f32 %v359_v46  ;;  %vm393_vm13 = vweird.f32 %v1472_v57  ;;  %vm379_vm15 = vmor %vm377_vm14, %vm378_vm12  ;;  %v411_v41 = vand.u32 2147483647, %v371_v49 }
 0x169   :  { %v374_v58 = vsub.f32 1.0, %v373_v42  ;;  %vm394_vm2 = vmor %vm392_vm0, %vm393_vm13  ;;  %v399_v42 = vor.u32 1.1754944e-38, %v398_v44 }
 0x16a   :  { %v389_v0 = vsub.f32 1.0, %v388_v45  ;;  %vm412_vm7 = vcmp.eq.f32.partialorder %v411_v41, 8.507059e+37 }
 0x16b   :  { %v375_v53 = vmul.f32 %v1470_v56, %v374_v58 }
 0x16c   :  { %v390_v61 = vmul.f32 %v1472_v57, %v389_v0 }
 0x16d   :  { %v1474_v51 = vpop.eup %1473  ;;  %v376_v52 = vadd.f32 %v1470_v56, %v375_v53 }
 0x16e   :  { %v403_v54 = vmul.f32 %v1474_v51, %v371_v49  ;;  %v391_v40 = vadd.f32 %v1472_v57, %v390_v61  ;;  %v1476_v46 = vpop.eup %1475  ;;  %vm408_vm4 = vweird.f32 %v1474_v51  ;;  %v413_v61 = vand.u32 2147483648, %v371_v49  ;;  %v429_v49 = vld [vmem:[#allocation6 + $0x58] sm:$0xff] }
 0x16f   :  { %v380_v38 = vsel %vm379_vm15, %v1470_v56, %v376_v52  ;;  %vm409_vm6 = vmor %vm407_vm5, %vm408_vm4 }
 0x170   :  { %v404_v45 = vsub.f32 1.0, %v403_v54  ;;  %v385_v58 = vsel %vm382_vm1, %v384_v48, %v380_v38  ;;  %v395_v37 = vsel %vm394_vm2, %v1472_v57, %v391_v40  ;;  %v414_v50 = vor.u32 1.1754944e-38, %v413_v61 }
 0x171   :  { %v400_v0 = vsel %vm397_vm3, %v399_v42, %v395_v37  ;;  %v418_v36 = vmul.f32 %v385_v58, %v2128_v59 }
 0x172   :  { %v405_v34 = vmul.f32 %v1474_v51, %v404_v45  ;;  %v419_v62 = vmul.f32 %v1476_v46, %v400_v0 }
 0x174   :  { %v2196_v53 = vadd.f32 %v419_v62, %v418_v36  ;;  %v406_v63 = vadd.f32 %v1474_v51, %v405_v34 }
 0x176   :  { %1477 = vtanh.f32 %v2196_v53  ;;  %v410_v56 = vsel %vm409_vm6, %v1474_v51, %v406_v63 }
 0x177   :  { %v415_v40 = vsel %vm412_vm7, %v414_v50, %v410_v56 }
 0x17c   :  { %v1478_v38 = vpop.eup %1477 }
 0x17d   :  { %v422_v37 = vmul.f32 %v1478_v38, %v415_v40 }
 0x17f   :  { %424 = vst [vmem:[#allocation9 + $0x8] sm:$0xff] %v422_v37  ;;  %446 = vmatmul.f32.vlgmr.msra.gmra.mxu0 %v422_v37  ;;  %466 = vmatmul.f32.vlgmr.msra.gmra.mxu1 %v422_v37 }
 0x180   :  { %486 = vmatmul.f32.vlgmr.msra.gmra.mxu2 %v422_v37  ;;  %506 = vmatmul.f32.vlgmr.msra.gmra.mxu3 %v422_v37 }
 0x181   :  { %738 = vmatpush.msra.mxu0 %v2751_v60  ;;  %758 = vmatpush.msra.mxu1 %v1810_v1  ;;  %v2778_v1 = vld [vmem:[#allocation22_spill] sm:$0xff] }
 0x182   :  { %778 = vmatpush.msra.mxu2 %v1812_v2  ;;  %798 = vmatpush.msra.mxu3 %v1854_v17  ;;  %v2779_v2 = vld [vmem:[#allocation35_spill] sm:$0xff]  ;;  %v2794_v17 = vld [vmem:[#allocation34_spill] sm:$0xff] }
 0x183   :  { %739 = vmatpush.msra.mxu0 %v1816_v3  ;;  %759 = vmatpush.msra.mxu1 %v1818_v4  ;;  %v2780_v3 = vld [vmem:[#allocation23_spill] sm:$0xff]  ;;  %v2781_v4 = vld [vmem:[#allocation24_spill] sm:$0xff] }
 0x184   :  { %779 = vmatpush.msra.mxu2 %v1820_v5  ;;  %799 = vmatpush.msra.mxu3 %v1860_v19  ;;  %v2782_v5 = vld [vmem:[#allocation25_spill] sm:$0xff]  ;;  %v2796_v19 = vld [vmem:[#allocation36_spill] sm:$0xff] }
 0x185   :  { %740 = vmatpush.msra.mxu0 %v1823_v6  ;;  %760 = vmatpush.msra.mxu1 %v1825_v7  ;;  %v2783_v6 = vld [vmem:[#allocation39_spill] sm:$0xff]  ;;  %v2784_v7 = vld [vmem:[#allocation26_spill] sm:$0xff] }
 0x186   :  { %780 = vmatpush.msra.mxu2 %v1829_v8  ;;  %800 = vmatpush.msra.mxu3 %v1872_v23  ;;  %v2785_v8 = vld [vmem:[#allocation27_spill] sm:$0xff]  ;;  %v2800_v23 = vld [vmem:[#allocation40_spill] sm:$0xff] }
 0x187   :  { %741 = vmatpush.msra.mxu0 %v1832_v9  ;;  %761 = vmatpush.msra.mxu1 %v1834_v10  ;;  %v2786_v9 = vld [vmem:[#allocation28_spill] sm:$0xff]  ;;  %v2787_v10 = vld [vmem:[#allocation43_spill] sm:$0xff] }
 0x188   :  { %781 = vmatpush.msra.mxu2 %v1838_v11  ;;  %801 = vmatpush.msra.mxu3 %v1884_v27  ;;  %v2788_v11 = vld [vmem:[#allocation29_spill] sm:$0xff]  ;;  %v426_v27 = vld [vmem:[#allocation6 + $0x40] sm:$0xff] }
 0x189   :  { %742 = vmatpush.msra.mxu0 %v1841_v12  ;;  %762 = vmatpush.msra.mxu1 %v1843_v13  ;;  %v2789_v12 = vld [vmem:[#allocation30_spill] sm:$0xff]  ;;  %v2790_v13 = vld [vmem:[#allocation31_spill] sm:$0xff] }
 0x18a   :  { %782 = vmatpush.msra.mxu2 %v1847_v14  ;;  %802 = vmatpush.msra.mxu3 %v1896_v31  ;;  %v2791_v14 = vld [vmem:[#allocation44_spill] sm:$0xff] }
 0x18b   :  { %743 = vmatpush.msra.mxu0 %v1850_v15  ;;  %763 = vmatpush.msra.mxu1 %v1852_v16  ;;  %v2792_v15 = vld [vmem:[#allocation32_spill] sm:$0xff]  ;;  %v2793_v16 = vld [vmem:[#allocation33_spill] sm:$0xff] }
 0x18c   :  { %783 = vmatpush.msra.mxu2 %v1858_v18  ;;  %803 = vmatpush.msra.mxu3 %v1908_v35  ;;  %v2795_v18 = vld [vmem:[#allocation45_spill] sm:$0xff] }
 0x18d   :  { %744 = vmatpush.msra.mxu0 %v1863_v20  ;;  %764 = vmatpush.msra.mxu1 %v1865_v21  ;;  %v2797_v20 = vld [vmem:[#allocation37_spill] sm:$0xff]  ;;  %v2798_v21 = vld [vmem:[#allocation38_spill] sm:$0xff] }
 0x18e   :  { %784 = vmatpush.msra.mxu2 %v1870_v22  ;;  %804 = vmatpush.msra.mxu3 %v1920_v39  ;;  %v2799_v22 = vld [vmem:[#allocation46_spill] sm:$0xff]  ;;  %v428_v39 = vld [vmem:[#allocation6 + $0x50] sm:$0xff] }
 0x18f   :  { %745 = vmatpush.msra.mxu0 %v1875_v24  ;;  %765 = vmatpush.msra.mxu1 %v1877_v25  ;;  %v2801_v24 = vld [vmem:[#allocation41_spill] sm:$0xff]  ;;  %v2802_v25 = vld [vmem:[#allocation42_spill] sm:$0xff] }
 0x190   :  { %785 = vmatpush.msra.mxu2 %v1882_v26  ;;  %805 = vmatpush.msra.mxu3 %v1932_v43  ;;  %v2803_v26 = vld [vmem:[#allocation47_spill] sm:$0xff] }
 0x191   :  { %746 = vmatpush.msra.mxu0 %v1887_v28  ;;  %766 = vmatpush.msra.mxu1 %v1889_v29  ;;  %v427_v28 = vld [vmem:[#allocation6 + $0x48] sm:$0xff] }
 0x192   :  { %786 = vmatpush.msra.mxu2 %v1894_v30  ;;  %806 = vmatpush.msra.mxu3 %v1944_v47 }
 0x193   :  { %747 = vmatpush.msra.mxu0 %v1899_v32  ;;  %767 = vmatpush.msra.mxu1 %v1901_v33 }
 0x194   :  { %787 = vmatpush.msra.mxu2 %v2778_v1  ;;  %807 = vmatpush.msra.mxu3 %v2779_v2 }
 0x195   :  { %748 = vmatpush.msra.mxu0 %v2780_v3  ;;  %768 = vmatpush.msra.mxu1 %v2781_v4 }
 0x196   :  { %788 = vmatpush.msra.mxu2 %v2782_v5  ;;  %808 = vmatpush.msra.mxu3 %v2783_v6 }
 0x197   :  { %749 = vmatpush.msra.mxu0 %v2784_v7  ;;  %769 = vmatpush.msra.mxu1 %v2785_v8 }
 0x198   :  { %789 = vmatpush.msra.mxu2 %v2786_v9  ;;  %809 = vmatpush.msra.mxu3 %v2787_v10 }
 0x199   :  { %750 = vmatpush.msra.mxu0 %v2788_v11  ;;  %770 = vmatpush.msra.mxu1 %v2789_v12 }
 0x19a   :  { %790 = vmatpush.msra.mxu2 %v2790_v13  ;;  %810 = vmatpush.msra.mxu3 %v2791_v14 }
 0x19b   :  { %751 = vmatpush.msra.mxu0 %v2792_v15  ;;  %771 = vmatpush.msra.mxu1 %v2793_v16 }
 0x19c   :  { %791 = vmatpush.msra.mxu2 %v2794_v17  ;;  %811 = vmatpush.msra.mxu3 %v2795_v18 }
 0x19d   :  { %752 = vmatpush.msra.mxu0 %v2796_v19  ;;  %772 = vmatpush.msra.mxu1 %v2797_v20 }
 0x19e   :  { %792 = vmatpush.msra.mxu2 %v2798_v21  ;;  %812 = vmatpush.msra.mxu3 %v2799_v22  ;;  %v2270_v21 = vld [vmem:[#allocation2 + $0x1e8] sm:$0xff]  ;;  %v2273_v22 = vld [vmem:[#allocation2 + $0x1f0] sm:$0xff] }
 0x19f   :  { %753 = vmatpush.msra.mxu0 %v2800_v23  ;;  %773 = vmatpush.msra.mxu1 %v2801_v24  ;;  %v2276_v23 = vld [vmem:[#allocation2 + $0x1f8] sm:$0xff]  ;;  %v2279_v24 = vld [vmem:[#allocation2 + $0x1c0] sm:$0xff] }
 0x1a0   :  { %793 = vmatpush.msra.mxu2 %v2802_v25  ;;  %813 = vmatpush.msra.mxu3 %v2803_v26  ;;  %v2282_v25 = vld [vmem:[#allocation2 + $0x1c8] sm:$0xff]  ;;  %v2285_v26 = vld [vmem:[#allocation2 + $0x1d0] sm:$0xff] }
 0x1fc   :  { %v447_v29 = vpop.f32.mrf.mxu0  ;;  %v467_v30 = vpop.f32.mrf.mxu1 }
 0x1fd   :  { %v510_v31 = vadd.f32 %v447_v29, %v426_v27  ;;  %v511_v32 = vadd.f32 %v467_v30, %v427_v28  ;;  %v2288_v27 = vld [vmem:[#allocation2 + $0x1d8] sm:$0xff]  ;;  %v2291_v28 = vld [vmem:[#allocation2 + $0x1a0] sm:$0xff]  ;;  %v2294_v29 = vld [vmem:[#allocation2 + $0x1a8] sm:$0xff] }
 0x1fe   :  { %v2297_v30 = vld [vmem:[#allocation2 + $0x1b0] sm:$0xff] }
 0x1ff   :  { %v1418_v33 = vmul.f32 -1.442695, %v510_v31  ;;  %v1419_v35 = vmul.f32 -1.442695, %v511_v32  ;;  %v2300_v31 = vld [vmem:[#allocation2 + $0x1b8] sm:$0xff]  ;;  %v2303_v32 = vld [vmem:[#allocation2 + $0x180] sm:$0xff] }
 0x201   :  { %1479 = vpow2.f32 %v1418_v33  ;;  %v2306_v33 = vld [vmem:[#allocation2 + $0x188] sm:$0xff] }
 0x202   :  { %1481 = vpow2.f32 %v1419_v35  ;;  %v2309_v35 = vld [vmem:[#allocation2 + $0x190] sm:$0xff] }
 0x203   :  { %v487_v43 = vpop.f32.mrf.mxu2  ;;  %v507_v57 = vpop.f32.mrf.mxu3 }
 0x204   :  { %v512_v47 = vadd.f32 %v487_v43, %v428_v39  ;;  %v513_v48 = vadd.f32 %v507_v57, %v429_v49  ;;  %v2312_v39 = vld [vmem:[#allocation2 + $0x198] sm:$0xff]  ;;  %v2315_v43 = vld [vmem:[#allocation2 + $0x160] sm:$0xff] }
 0x205   :  { %v2336_v49 = vld [vmem:[#allocation2 + $0x158] sm:$0xff]  ;;  %v2339_v57 = vld [vmem:[#allocation2 + $0x120] sm:$0xff] }
 0x206   :  { %v1420_v60 = vmul.f32 -1.442695, %v512_v47  ;;  %v2318_v47 = vld [vmem:[#allocation2 + $0x168] sm:$0xff] }
 0x207   :  { %v1480_v59 = vpop.eup %1479 }
 0x208   :  { %v1482_v34 = vpop.eup %1481  ;;  %v523_v36 = vadd.f32 1.0, %v1480_v59  ;;  %1483 = vpow2.f32 %v1420_v60  ;;  %v2321_v60 = vld [vmem:[#allocation2 + $0x170] sm:$0xff]  ;;  %v2324_v59 = vld [vmem:[#allocation2 + $0x178] sm:$0xff] }
 0x209   :  { %v524_v51 = vadd.f32 1.0, %v1482_v34  ;;  %v2327_v34 = vld [vmem:[#allocation2 + $0x140] sm:$0xff] }
 0x20a   :  { %1485 = vrcp.f32 %v523_v36  ;;  %v537_v58 = vand.u32 2147483648, %v523_v36  ;;  %v535_v63 = vand.u32 2147483647, %v523_v36  ;;  %vm531_vm10 = vweird.f32 %v523_v36 }
 0x20b   :  { %1487 = vrcp.f32 %v524_v51  ;;  %v552_v61 = vand.u32 2147483648, %v524_v51  ;;  %v550_v56 = vand.u32 2147483647, %v524_v51  ;;  %vm546_vm12 = vweird.f32 %v524_v51 }
 0x20c   :  { %v538_v40 = vor.u32 1.1754944e-38, %v537_v58  ;;  %vm536_vm13 = vcmp.eq.f32.partialorder %v535_v63, 8.507059e+37  ;;  %v2366_v58 = vld [vmem:[#allocation2 + $0xe8] sm:$0xff]  ;;  %v2375_v63 = vld [vmem:[#allocation2 + $0xc0] sm:$0xff] }
 0x20d   :  { %v553_v3 = vor.u32 1.1754944e-38, %v552_v61  ;;  %vm551_vm15 = vcmp.eq.f32.partialorder %v550_v56, 8.507059e+37  ;;  %v2378_v61 = vld [vmem:[#allocation2 + $0xc8] sm:$0xff]  ;;  %v2384_v56 = vld [vmem:[#allocation2 + $0xd8] sm:$0xff] }
 0x20e   :  { %v1484_v44 = vpop.eup %1483  ;;  %2805 = vst [vmem:[#allocation22_spill] sm:$0xff] %v2384_v56 }
 0x20f   :  { %v525_v55 = vadd.f32 1.0, %v1484_v44  ;;  %v2342_v44 = vld [vmem:[#allocation2 + $0x128] sm:$0xff] }
 0x210   :  { %v1486_v52 = vpop.eup %1485 }
 0x211   :  { %v1488_v54 = vpop.eup %1487  ;;  %v527_v42 = vmul.f32 %v1486_v52, %v523_v36  ;;  %1489 = vrcp.f32 %v525_v55  ;;  %vm532_vm8 = vweird.f32 %v1486_v52  ;;  %v567_v14 = vand.u32 2147483648, %v525_v55  ;;  %v2330_v36 = vld [vmem:[#allocation2 + $0x148] sm:$0xff] }
 0x212   :  { %v542_v46 = vmul.f32 %v1488_v54, %v524_v51  ;;  %1491 = vtanh.f32 %v513_v48  ;;  %vm547_vm9 = vweird.f32 %v1488_v54  ;;  %vm533_vm11 = vmor %vm531_vm10, %vm532_vm8  ;;  %vm561_vm1 = vweird.f32 %v525_v55  ;;  %v2333_v51 = vld [vmem:[#allocation2 + $0x150] sm:$0xff]  ;;  %v2351_v48 = vld [vmem:[#allocation2 + $0x100] sm:$0xff] }
 0x213   :  { %v528_v45 = vsub.f32 1.0, %v527_v42  ;;  %vm548_vm14 = vmor %vm546_vm12, %vm547_vm9  ;;  %v565_v15 = vand.u32 2147483647, %v525_v55  ;;  %v568_v17 = vor.u32 1.1754944e-38, %v567_v14  ;;  %v2357_v42 = vld [vmem:[#allocation2 + $0x110] sm:$0xff]  ;;  %v2435_v14 = vld [vmem:[#allocation2 + $0x20] sm:$0xff] }
 0x214   :  { %v543_v0 = vsub.f32 1.0, %v542_v46  ;;  %v2360_v46 = vld [vmem:[#allocation2 + $0x118] sm:$0xff]  ;;  %2822 = vst [vmem:[#allocation45_spill] sm:$0xff] %v2435_v14 }
 0x215   :  { %v529_v62 = vmul.f32 %v1486_v52, %v528_v45  ;;  %vm566_vm3 = vcmp.eq.f32.partialorder %v565_v15, 8.507059e+37  ;;  %v2363_v45 = vld [vmem:[#allocation2 + $0xe0] sm:$0xff]  ;;  %v2438_v15 = vld [vmem:[#allocation2 + $0x28] sm:$0xff] }
 0x216   :  { %v544_v41 = vmul.f32 %v1488_v54, %v543_v0  ;;  %v2369_v0 = vld [vmem:[#allocation2 + $0xf0] sm:$0xff]  ;;  %2823 = vst [vmem:[#allocation36_spill] sm:$0xff] %v2438_v15 }
 0x217   :  { %v1490_v50 = vpop.eup %1489  ;;  %v530_v38 = vadd.f32 %v1486_v52, %v529_v62  ;;  %v2372_v62 = vld [vmem:[#allocation2 + $0xf8] sm:$0xff] }
 0x218   :  { %v557_v37 = vmul.f32 %v1490_v50, %v525_v55  ;;  %v545_v1 = vadd.f32 %v1488_v54, %v544_v41  ;;  %v1492_v4 = vpop.eup %1491  ;;  %vm562_vm0 = vweird.f32 %v1490_v50  ;;  %v2345_v55 = vld [vmem:[#allocation2 + $0x130] sm:$0xff] }
 0x219   :  { %v534_v2 = vsel %vm533_vm11, %v1486_v52, %v530_v38  ;;  %vm563_vm2 = vmor %vm561_vm1, %vm562_vm0  ;;  %v2348_v52 = vld [vmem:[#allocation2 + $0x138] sm:$0xff]  ;;  %v2381_v41 = vld [vmem:[#allocation2 + $0xd0] sm:$0xff] }
 0x21a   :  { %v558_v5 = vsub.f32 1.0, %v557_v37  ;;  %v539_v6 = vsel %vm536_vm13, %v538_v40, %v534_v2  ;;  %v549_v7 = vsel %vm548_vm14, %v1488_v54, %v545_v1  ;;  %v2354_v54 = vld [vmem:[#allocation2 + $0x108] sm:$0xff]  ;;  %2804 = vst [vmem:[#allocation21_spill] sm:$0xff] %v2381_v41  ;;  %v2393_v40 = vld [vmem:[#allocation2 + $0xb0] sm:$0xff]  ;;  %v2396_v37 = vld [vmem:[#allocation2 + $0xb8] sm:$0xff] }
 0x21b   :  { %v554_v8 = vsel %vm551_vm15, %v553_v3, %v549_v7  ;;  %v572_v9 = vmul.f32 %v539_v6, %v2196_v53  ;;  %v2267_v53 = vld [vmem:[#allocation2 + $0x1e0] sm:$0xff]  ;;  %v2390_v38 = vld [vmem:[#allocation2 + $0xa8] sm:$0xff]  ;;  %2808 = vst [vmem:[#allocation24_spill] sm:$0xff] %v2393_v40  ;;  %v2405_v3 = vld [vmem:[#allocation2 + $0x90] sm:$0xff] }
 0x21c   :  { %v559_v10 = vmul.f32 %v1490_v50, %v558_v5  ;;  %v573_v11 = vmul.f32 %v1492_v4, %v554_v8  ;;  %2807 = vst [vmem:[#allocation23_spill] sm:$0xff] %v2390_v38  ;;  %v2399_v1 = vld [vmem:[#allocation2 + $0x80] sm:$0xff]  ;;  %v2402_v2 = vld [vmem:[#allocation2 + $0x88] sm:$0xff]  ;;  %v2408_v4 = vld [vmem:[#allocation2 + $0x98] sm:$0xff] }
 0x21d   :  { %2809 = vst [vmem:[#allocation25_spill] sm:$0xff] %v2396_v37  ;;  %v2411_v5 = vld [vmem:[#allocation2 + $0x60] sm:$0xff]  ;;  %v2414_v6 = vld [vmem:[#allocation2 + $0x68] sm:$0xff]  ;;  %v2417_v7 = vld [vmem:[#allocation2 + $0x70] sm:$0xff] }
 0x21e   :  { %v2264_v12 = vadd.f32 %v573_v11, %v572_v9  ;;  %v560_v13 = vadd.f32 %v1490_v50, %v559_v10  ;;  %2810 = vst [vmem:[#allocation39_spill] sm:$0xff] %v2399_v1  ;;  %v2420_v8 = vld [vmem:[#allocation2 + $0x78] sm:$0xff]  ;;  %v2423_v9 = vld [vmem:[#allocation2 + $0x40] sm:$0xff]  ;;  %v2426_v10 = vld [vmem:[#allocation2 + $0x48] sm:$0xff] }
 0x21f   :  { %2811 = vst [vmem:[#allocation26_spill] sm:$0xff] %v2402_v2  ;;  %v2429_v11 = vld [vmem:[#allocation2 + $0x50] sm:$0xff] }
 0x220   :  { %1493 = vtanh.f32 %v2264_v12  ;;  %v564_v16 = vsel %vm563_vm2, %v1490_v50, %v560_v13  ;;  %v2387_v50 = vld [vmem:[#allocation2 + $0xa0] sm:$0xff]  ;;  %2812 = vst [vmem:[#allocation27_spill] sm:$0xff] %v2405_v3  ;;  %v2432_v13 = vld [vmem:[#allocation2 + $0x58] sm:$0xff] }
 0x221   :  { %v569_v19 = vsel %vm566_vm3, %v568_v17, %v564_v16  ;;  %2806 = vst [vmem:[#allocation35_spill] sm:$0xff] %v2387_v50  ;;  %v2441_v16 = vld [vmem:[#allocation2 + $0x30] sm:$0xff]  ;;  %v2444_v17 = vld [vmem:[#allocation2 + $0x38] sm:$0xff] }
 0x222   :  { %2813 = vst [vmem:[#allocation28_spill] sm:$0xff] %v2408_v4 }
 0x223   :  { %2814 = vst [vmem:[#allocation43_spill] sm:$0xff] %v2411_v5 }
 0x224   :  { %2815 = vst [vmem:[#allocation29_spill] sm:$0xff] %v2414_v6 }
 0x225   :  { %2816 = vst [vmem:[#allocation30_spill] sm:$0xff] %v2417_v7 }
 0x226   :  { %v1494_v18 = vpop.eup %1493  ;;  %2817 = vst [vmem:[#allocation31_spill] sm:$0xff] %v2420_v8 }
 0x227   :  { %v576_v20 = vmul.f32 %v1494_v18, %v569_v19  ;;  %2818 = vst [vmem:[#allocation44_spill] sm:$0xff] %v2423_v9  ;;  %v2447_v18 = vld [vmem:[#allocation2] sm:$0xff]  ;;  %v2450_v19 = vld [vmem:[#allocation2 + $0x8] sm:$0xff] }
 0x228   :  { %2819 = vst [vmem:[#allocation32_spill] sm:$0xff] %v2426_v10 }
 0x229   :  { %578 = vst [vmem:[#allocation9 + $0x10] sm:$0xff] %v576_v20  ;;  %600 = vmatmul.f32.vlgmr.msrb.gmra.mxu0 %v576_v20  ;;  %620 = vmatmul.f32.vlgmr.msrb.gmra.mxu1 %v576_v20 }
 0x22a   :  { %640 = vmatmul.f32.vlgmr.msrb.gmra.mxu2 %v576_v20  ;;  %660 = vmatmul.f32.vlgmr.msrb.gmra.mxu3 %v576_v20  ;;  %2820 = vst [vmem:[#allocation33_spill] sm:$0xff] %v2429_v11  ;;  %v2453_v20 = vld [vmem:[#allocation2 + $0x10] sm:$0xff] }
 0x22b   :  { %892 = vmatpush.msrb.mxu0 %v2267_v53  ;;  %912 = vmatpush.msrb.mxu1 %v2270_v21  ;;  %2821 = vst [vmem:[#allocation34_spill] sm:$0xff] %v2432_v13 }
 0x22c   :  { %932 = vmatpush.msrb.mxu2 %v2273_v22  ;;  %952 = vmatpush.msrb.mxu3 %v2276_v23  ;;  %2824 = vst [vmem:[#allocation37_spill] sm:$0xff] %v2441_v16 }
 0x22d   :  { %893 = vmatpush.msrb.mxu0 %v2279_v24  ;;  %913 = vmatpush.msrb.mxu1 %v2282_v25  ;;  %2825 = vst [vmem:[#allocation38_spill] sm:$0xff] %v2444_v17 }
 0x22e   :  { %933 = vmatpush.msrb.mxu2 %v2285_v26  ;;  %953 = vmatpush.msrb.mxu3 %v2288_v27  ;;  %2826 = vst [vmem:[#allocation46_spill] sm:$0xff] %v2447_v18 }
 0x22f   :  { %894 = vmatpush.msrb.mxu0 %v2291_v28  ;;  %914 = vmatpush.msrb.mxu1 %v2294_v29  ;;  %2827 = vst [vmem:[#allocation40_spill] sm:$0xff] %v2450_v19 }
 0x230   :  { %934 = vmatpush.msrb.mxu2 %v2297_v30  ;;  %954 = vmatpush.msrb.mxu3 %v2300_v31  ;;  %2828 = vst [vmem:[#allocation41_spill] sm:$0xff] %v2453_v20 }
 0x231   :  { %895 = vmatpush.msrb.mxu0 %v2303_v32  ;;  %915 = vmatpush.msrb.mxu1 %v2306_v33 }
 0x232   :  { %935 = vmatpush.msrb.mxu2 %v2309_v35  ;;  %955 = vmatpush.msrb.mxu3 %v2312_v39 }
 0x233   :  { %896 = vmatpush.msrb.mxu0 %v2315_v43  ;;  %916 = vmatpush.msrb.mxu1 %v2318_v47 }
 0x234   :  { %936 = vmatpush.msrb.mxu2 %v2321_v60  ;;  %956 = vmatpush.msrb.mxu3 %v2324_v59 }
 0x235   :  { %897 = vmatpush.msrb.mxu0 %v2327_v34  ;;  %917 = vmatpush.msrb.mxu1 %v2330_v36 }
 0x236   :  { %937 = vmatpush.msrb.mxu2 %v2333_v51  ;;  %957 = vmatpush.msrb.mxu3 %v2336_v49 }
 0x237   :  { %898 = vmatpush.msrb.mxu0 %v2339_v57  ;;  %918 = vmatpush.msrb.mxu1 %v2342_v44 }
 0x238   :  { %938 = vmatpush.msrb.mxu2 %v2345_v55  ;;  %958 = vmatpush.msrb.mxu3 %v2348_v52 }
 0x239   :  { %899 = vmatpush.msrb.mxu0 %v2351_v48  ;;  %919 = vmatpush.msrb.mxu1 %v2354_v54 }
 0x23a   :  { %939 = vmatpush.msrb.mxu2 %v2357_v42  ;;  %959 = vmatpush.msrb.mxu3 %v2360_v46 }
 0x23b   :  { %900 = vmatpush.msrb.mxu0 %v2363_v45  ;;  %920 = vmatpush.msrb.mxu1 %v2366_v58 }
 0x23c   :  { %940 = vmatpush.msrb.mxu2 %v2369_v0  ;;  %960 = vmatpush.msrb.mxu3 %v2372_v62 }
 0x23d   :  { %901 = vmatpush.msrb.mxu0 %v2375_v63  ;;  %921 = vmatpush.msrb.mxu1 %v2378_v61 }
 0x23e   :  { %941 = vmatpush.msrb.mxu2 %v2381_v41  ;;  %961 = vmatpush.msrb.mxu3 %v2384_v56 }
 0x23f   :  { %902 = vmatpush.msrb.mxu0 %v2387_v50  ;;  %922 = vmatpush.msrb.mxu1 %v2390_v38 }
 0x240   :  { %942 = vmatpush.msrb.mxu2 %v2393_v40  ;;  %962 = vmatpush.msrb.mxu3 %v2396_v37 }
 0x241   :  { %903 = vmatpush.msrb.mxu0 %v2399_v1  ;;  %923 = vmatpush.msrb.mxu1 %v2402_v2 }
 0x242   :  { %943 = vmatpush.msrb.mxu2 %v2405_v3  ;;  %963 = vmatpush.msrb.mxu3 %v2408_v4 }
 0x243   :  { %904 = vmatpush.msrb.mxu0 %v2411_v5  ;;  %924 = vmatpush.msrb.mxu1 %v2414_v6 }
 0x244   :  { %944 = vmatpush.msrb.mxu2 %v2417_v7  ;;  %964 = vmatpush.msrb.mxu3 %v2420_v8  ;;  %v582_v8 = vld [vmem:[#allocation6 + $0x70] sm:$0xff] }
 0x245   :  { %905 = vmatpush.msrb.mxu0 %v2423_v9  ;;  %925 = vmatpush.msrb.mxu1 %v2426_v10 }
 0x246   :  { %945 = vmatpush.msrb.mxu2 %v2429_v11  ;;  %965 = vmatpush.msrb.mxu3 %v2432_v13 }
 0x247   :  { %906 = vmatpush.msrb.mxu0 %v2435_v14  ;;  %926 = vmatpush.msrb.mxu1 %v2438_v15  ;;  %v2456_v15 = vld [vmem:[#allocation2 + $0x18] sm:$0xff]  ;;  %v581_v14 = vld [vmem:[#allocation6 + $0x68] sm:$0xff] }
 0x248   :  { %946 = vmatpush.msrb.mxu2 %v2441_v16  ;;  %966 = vmatpush.msrb.mxu3 %v2444_v17  ;;  %2829 = vst [vmem:[#allocation42_spill] sm:$0xff] %v2456_v15  ;;  %v580_v16 = vld [vmem:[#allocation6 + $0x60] sm:$0xff] }
 0x249   :  { %907 = vmatpush.msrb.mxu0 %v2447_v18  ;;  %927 = vmatpush.msrb.mxu1 %v2450_v19 }
 0x24a   :  { %947 = vmatpush.msrb.mxu2 %v2453_v20  ;;  %967 = vmatpush.msrb.mxu3 %v2456_v15  ;;  %v583_v15 = vld [vmem:[#allocation6 + $0x78] sm:$0xff] }
 0x2a6   :  { %v601_v13 = vpop.f32.mrf.mxu0  ;;  %v621_v17 = vpop.f32.mrf.mxu1 }
 0x2a7   :  { %v664_v11 = vadd.f32 %v601_v13, %v580_v16  ;;  %v665_v10 = vadd.f32 %v621_v17, %v581_v14 }
 0x2a9   :  { %v1421_v9 = vmul.f32 -1.442695, %v664_v11  ;;  %v1422_v18 = vmul.f32 -1.442695, %v665_v10 }
 0x2ab   :  { %1495 = vpow2.f32 %v1421_v9 }
 0x2ac   :  { %1497 = vpow2.f32 %v1422_v18 }
 0x2ad   :  { %v641_v19 = vpop.f32.mrf.mxu2  ;;  %v661_v2 = vpop.f32.mrf.mxu3 }
 0x2ae   :  { %v666_v7 = vadd.f32 %v641_v19, %v582_v8  ;;  %v667_v11 = vadd.f32 %v661_v2, %v583_v15 }
 0x2b0   :  { %v1423_v6 = vmul.f32 -1.442695, %v666_v7 }
 0x2b1   :  { %v1496_v5 = vpop.eup %1495 }
 0x2b2   :  { %v1498_v20 = vpop.eup %1497  ;;  %v677_v4 = vadd.f32 1.0, %v1496_v5  ;;  %1499 = vpow2.f32 %v1423_v6 }
 0x2b3   :  { %v678_v3 = vadd.f32 1.0, %v1498_v20 }
 0x2b4   :  { %1501 = vrcp.f32 %v677_v4  ;;  %v691_v8 = vand.u32 2147483648, %v677_v4  ;;  %v689_v5 = vand.u32 2147483647, %v677_v4  ;;  %vm685_vm6 = vweird.f32 %v677_v4 }
 0x2b5   :  { %1503 = vrcp.f32 %v678_v3  ;;  %v706_v6 = vand.u32 2147483648, %v678_v3  ;;  %v704_v20 = vand.u32 2147483647, %v678_v3  ;;  %vm700_vm8 = vweird.f32 %v678_v3 }
 0x2b6   :  { %v692_v2 = vor.u32 1.1754944e-38, %v691_v8  ;;  %vm690_vm9 = vcmp.eq.f32.partialorder %v689_v5, 8.507059e+37 }
 0x2b7   :  { %vm705_vm11 = vcmp.eq.f32.partialorder %v704_v20, 8.507059e+37  ;;  %v2837_v20 = vld [vmem:[#allocation26_spill] sm:$0xff] }
 0x2b8   :  { %v1500_v1 = vpop.eup %1499 }
 0x2b9   :  { %v679_v13 = vadd.f32 1.0, %v1500_v1 }
 0x2ba   :  { %v1502_v14 = vpop.eup %1501 }
 0x2bb   :  { %v1504_v10 = vpop.eup %1503  ;;  %v681_v9 = vmul.f32 %v1502_v14, %v677_v4  ;;  %1505 = vrcp.f32 %v679_v13  ;;  %vm686_vm4 = vweird.f32 %v1502_v14  ;;  %vm715_vm13 = vweird.f32 %v679_v13 }
 0x2bc   :  { %v696_v16 = vmul.f32 %v1504_v10, %v678_v3  ;;  %1507 = vtanh.f32 %v667_v11  ;;  %vm701_vm5 = vweird.f32 %v1504_v10  ;;  %vm687_vm7 = vmor %vm685_vm6, %vm686_vm4  ;;  %v719_v3 = vand.u32 2147483647, %v679_v13 }
 0x2bd   :  { %v682_v17 = vsub.f32 1.0, %v681_v9  ;;  %vm702_vm10 = vmor %vm700_vm8, %vm701_vm5  ;;  %v707_v9 = vor.u32 1.1754944e-38, %v706_v6  ;;  %v2836_v6 = vld [vmem:[#allocation39_spill] sm:$0xff] }
 0x2be   :  { %v697_v7 = vsub.f32 1.0, %v696_v16  ;;  %vm720_vm15 = vcmp.eq.f32.partialorder %v719_v3, 8.507059e+37  ;;  %v2849_v3 = vld [vmem:[#allocation36_spill] sm:$0xff] }
 0x2bf   :  { %v683_v18 = vmul.f32 %v1502_v14, %v682_v17 }
 0x2c0   :  { %v698_v19 = vmul.f32 %v1504_v10, %v697_v7 }
 0x2c1   :  { %v1506_v37 = vpop.eup %1505  ;;  %v684_v1 = vadd.f32 %v1502_v14, %v683_v18 }
 0x2c2   :  { %v711_v15 = vmul.f32 %v1506_v37, %v679_v13  ;;  %v699_v40 = vadd.f32 %v1504_v10, %v698_v19  ;;  %v1508_v11 = vpop.eup %1507  ;;  %vm716_vm12 = vweird.f32 %v1506_v37  ;;  %v721_v19 = vand.u32 2147483648, %v679_v13  ;;  %v2834_v13 = vld [vmem:[#allocation24_spill] sm:$0xff] }
 0x2c3   :  { %v688_v38 = vsel %vm687_vm7, %v1502_v14, %v684_v1  ;;  %vm717_vm14 = vmor %vm715_vm13, %vm716_vm12  ;;  %v2838_v1 = vld [vmem:[#allocation27_spill] sm:$0xff] }
 0x2c4   :  { %v712_v16 = vsub.f32 1.0, %v711_v15  ;;  %v693_v17 = vsel %vm690_vm9, %v692_v2, %v688_v38  ;;  %v703_v50 = vsel %vm702_vm10, %v1504_v10, %v699_v40  ;;  %v722_v5 = vor.u32 1.1754944e-38, %v721_v19  ;;  %v2835_v10 = vld [vmem:[#allocation25_spill] sm:$0xff]  ;;  %v2839_v2 = vld [vmem:[#allocation28_spill] sm:$0xff]  ;;  %v2840_v15 = vld [vmem:[#allocation43_spill] sm:$0xff] }
 0x2c5   :  { %v708_v7 = vsel %vm705_vm11, %v707_v9, %v703_v50  ;;  %v726_v56 = vmul.f32 %v693_v17, %v2264_v12  ;;  %v2830_v12 = vld [vmem:[#allocation21_spill] sm:$0xff]  ;;  %v2844_v17 = vld [vmem:[#allocation44_spill] sm:$0xff] }
 0x2c6   :  { %v713_v41 = vmul.f32 %v1506_v37, %v712_v16  ;;  %v727_v4 = vmul.f32 %v1508_v11, %v708_v7  ;;  %v2841_v9 = vld [vmem:[#allocation29_spill] sm:$0xff]  ;;  %v2842_v11 = vld [vmem:[#allocation30_spill] sm:$0xff]  ;;  %v2843_v16 = vld [vmem:[#allocation31_spill] sm:$0xff] }
 0x2c7   :  { %v2845_v7 = vld [vmem:[#allocation32_spill] sm:$0xff]  ;;  %v2848_v19 = vld [vmem:[#allocation45_spill] sm:$0xff] }
 0x2c8   :  { %v2460_v18 = vadd.f32 %v727_v4, %v726_v56  ;;  %v714_v8 = vadd.f32 %v1506_v37, %v713_v41  ;;  %v2831_v41 = vld [vmem:[#allocation22_spill] sm:$0xff]  ;;  %v2832_v56 = vld [vmem:[#allocation35_spill] sm:$0xff]  ;;  %v2846_v4 = vld [vmem:[#allocation33_spill] sm:$0xff] }
 0x2ca   :  { %1509 = vtanh.f32 %v2460_v18  ;;  %v718_v14 = vsel %vm717_vm14, %v1506_v37, %v714_v8  ;;  %v2833_v37 = vld [vmem:[#allocation23_spill] sm:$0xff]  ;;  %v2847_v8 = vld [vmem:[#allocation34_spill] sm:$0xff] }
 0x2cb   :  { %v723_v40 = vsel %vm720_vm15, %v722_v5, %v718_v14  ;;  %v2850_v14 = vld [vmem:[#allocation37_spill] sm:$0xff]  ;;  %v2851_v5 = vld [vmem:[#allocation38_spill] sm:$0xff] }
 0x2d0   :  { %v1510_v38 = vpop.eup %1509 }
 0x2d1   :  { %v730_v50 = vmul.f32 %v1510_v38, %v723_v40  ;;  %v2852_v38 = vld [vmem:[#allocation46_spill] sm:$0xff]  ;;  %v2853_v40 = vld [vmem:[#allocation40_spill] sm:$0xff] }
 0x2d3   :  { %732 = vst [vmem:[#allocation9 + $0x18] sm:$0xff] %v730_v50  ;;  %754 = vmatmul.f32.vlgmr.msra.gmra.mxu0 %v730_v50  ;;  %774 = vmatmul.f32.vlgmr.msra.gmra.mxu1 %v730_v50 }
 0x2d4   :  { %794 = vmatmul.f32.vlgmr.msra.gmra.mxu2 %v730_v50  ;;  %814 = vmatmul.f32.vlgmr.msra.gmra.mxu3 %v730_v50  ;;  %v2854_v50 = vld [vmem:[#allocation41_spill] sm:$0xff] }
 0x2d5   :  { %1046 = vmatpush.msra.mxu0 %v2267_v53  ;;  %1066 = vmatpush.msra.mxu1 %v2270_v21 }
 0x2d6   :  { %1086 = vmatpush.msra.mxu2 %v2273_v22  ;;  %1106 = vmatpush.msra.mxu3 %v2276_v23 }
 0x2d7   :  { %1047 = vmatpush.msra.mxu0 %v2279_v24  ;;  %1067 = vmatpush.msra.mxu1 %v2282_v25 }
 0x2d8   :  { %1087 = vmatpush.msra.mxu2 %v2285_v26  ;;  %1107 = vmatpush.msra.mxu3 %v2288_v27 }
 0x2d9   :  { %1048 = vmatpush.msra.mxu0 %v2291_v28  ;;  %1068 = vmatpush.msra.mxu1 %v2294_v29 }
 0x2da   :  { %1088 = vmatpush.msra.mxu2 %v2297_v30  ;;  %1108 = vmatpush.msra.mxu3 %v2300_v31 }
 0x2db   :  { %1049 = vmatpush.msra.mxu0 %v2303_v32  ;;  %1069 = vmatpush.msra.mxu1 %v2306_v33 }
 0x2dc   :  { %1089 = vmatpush.msra.mxu2 %v2309_v35  ;;  %1109 = vmatpush.msra.mxu3 %v2312_v39 }
 0x2dd   :  { %1050 = vmatpush.msra.mxu0 %v2315_v43  ;;  %1070 = vmatpush.msra.mxu1 %v2318_v47 }
 0x2de   :  { %1090 = vmatpush.msra.mxu2 %v2321_v60  ;;  %1110 = vmatpush.msra.mxu3 %v2324_v59 }
 0x2df   :  { %1051 = vmatpush.msra.mxu0 %v2327_v34  ;;  %1071 = vmatpush.msra.mxu1 %v2330_v36 }
 0x2e0   :  { %1091 = vmatpush.msra.mxu2 %v2333_v51  ;;  %1111 = vmatpush.msra.mxu3 %v2336_v49 }
 0x2e1   :  { %1052 = vmatpush.msra.mxu0 %v2339_v57  ;;  %1072 = vmatpush.msra.mxu1 %v2342_v44 }
 0x2e2   :  { %1092 = vmatpush.msra.mxu2 %v2345_v55  ;;  %1112 = vmatpush.msra.mxu3 %v2348_v52 }
 0x2e3   :  { %1053 = vmatpush.msra.mxu0 %v2351_v48  ;;  %1073 = vmatpush.msra.mxu1 %v2354_v54 }
 0x2e4   :  { %1093 = vmatpush.msra.mxu2 %v2357_v42  ;;  %1113 = vmatpush.msra.mxu3 %v2360_v46 }
 0x2e5   :  { %1054 = vmatpush.msra.mxu0 %v2363_v45  ;;  %1074 = vmatpush.msra.mxu1 %v2366_v58 }
 0x2e6   :  { %1094 = vmatpush.msra.mxu2 %v2369_v0  ;;  %1114 = vmatpush.msra.mxu3 %v2372_v62 }
 0x2e7   :  { %1055 = vmatpush.msra.mxu0 %v2375_v63  ;;  %1075 = vmatpush.msra.mxu1 %v2378_v61 }
 0x2e8   :  { %1095 = vmatpush.msra.mxu2 %v2830_v12  ;;  %1115 = vmatpush.msra.mxu3 %v2831_v41 }
 0x2e9   :  { %1056 = vmatpush.msra.mxu0 %v2832_v56  ;;  %1076 = vmatpush.msra.mxu1 %v2833_v37 }
 0x2ea   :  { %1096 = vmatpush.msra.mxu2 %v2834_v13  ;;  %1116 = vmatpush.msra.mxu3 %v2835_v10 }
 0x2eb   :  { %1057 = vmatpush.msra.mxu0 %v2836_v6  ;;  %1077 = vmatpush.msra.mxu1 %v2837_v20 }
 0x2ec   :  { %1097 = vmatpush.msra.mxu2 %v2838_v1  ;;  %1117 = vmatpush.msra.mxu3 %v2839_v2 }
 0x2ed   :  { %1058 = vmatpush.msra.mxu0 %v2840_v15  ;;  %1078 = vmatpush.msra.mxu1 %v2841_v9 }
 0x2ee   :  { %1098 = vmatpush.msra.mxu2 %v2842_v11  ;;  %1118 = vmatpush.msra.mxu3 %v2843_v16 }
 0x2ef   :  { %1059 = vmatpush.msra.mxu0 %v2844_v17  ;;  %1079 = vmatpush.msra.mxu1 %v2845_v7  ;;  %v2855_v17 = vld [vmem:[#allocation42_spill] sm:$0xff]  ;;  %v734_v7 = vld [vmem:[#allocation6 + $0x80] sm:$0xff] }
 0x2f0   :  { %1099 = vmatpush.msra.mxu2 %v2846_v4  ;;  %1119 = vmatpush.msra.mxu3 %v2847_v8  ;;  %v735_v4 = vld [vmem:[#allocation6 + $0x88] sm:$0xff] }
 0x2f1   :  { %1060 = vmatpush.msra.mxu0 %v2848_v19  ;;  %1080 = vmatpush.msra.mxu1 %v2849_v3 }
 0x2f2   :  { %1100 = vmatpush.msra.mxu2 %v2850_v14  ;;  %1120 = vmatpush.msra.mxu3 %v2851_v5  ;;  %v736_v14 = vld [vmem:[#allocation6 + $0x90] sm:$0xff] }
 0x2f3   :  { %1061 = vmatpush.msra.mxu0 %v2852_v38  ;;  %1081 = vmatpush.msra.mxu1 %v2853_v40 }
 0x2f4   :  { %1101 = vmatpush.msra.mxu2 %v2854_v50  ;;  %1121 = vmatpush.msra.mxu3 %v2855_v17  ;;  %v737_v17 = vld [vmem:[#allocation6 + $0x98] sm:$0xff] }
 0x350   :  { %v755_v16 = vpop.f32.mrf.mxu0  ;;  %v775_v8 = vpop.f32.mrf.mxu1 }
 0x351   :  { %v818_v11 = vadd.f32 %v755_v16, %v734_v7  ;;  %v819_v19 = vadd.f32 %v775_v8, %v735_v4 }
 0x353   :  { %v1424_v9 = vmul.f32 -1.442695, %v818_v11  ;;  %v1425_v3 = vmul.f32 -1.442695, %v819_v19 }
 0x355   :  { %1511 = vpow2.f32 %v1424_v9 }
 0x356   :  { %1513 = vpow2.f32 %v1425_v3 }
 0x357   :  { %v795_v5 = vpop.f32.mrf.mxu2  ;;  %v815_v20 = vpop.f32.mrf.mxu3 }
 0x358   :  { %v820_v15 = vadd.f32 %v795_v5, %v736_v14  ;;  %v821_v11 = vadd.f32 %v815_v20, %v737_v17 }
 0x35a   :  { %v1426_v38 = vmul.f32 -1.442695, %v820_v15 }
 0x35b   :  { %v1512_v2 = vpop.eup %1511 }
 0x35c   :  { %v1514_v40 = vpop.eup %1513  ;;  %v831_v1 = vadd.f32 1.0, %v1512_v2  ;;  %1515 = vpow2.f32 %v1426_v38 }
 0x35d   :  { %v832_v50 = vadd.f32 1.0, %v1514_v40 }
 0x35e   :  { %1517 = vrcp.f32 %v831_v1  ;;  %v845_v3 = vand.u32 2147483648, %v831_v1  ;;  %v843_v2 = vand.u32 2147483647, %v831_v1  ;;  %vm839_vm2 = vweird.f32 %v831_v1 }
 0x35f   :  { %1519 = vrcp.f32 %v832_v50  ;;  %v860_v5 = vand.u32 2147483648, %v832_v50  ;;  %v858_v40 = vand.u32 2147483647, %v832_v50  ;;  %vm854_vm4 = vweird.f32 %v832_v50 }
 0x360   :  { %v846_v20 = vor.u32 1.1754944e-38, %v845_v3  ;;  %vm844_vm5 = vcmp.eq.f32.partialorder %v843_v2, 8.507059e+37 }
 0x361   :  { %vm859_vm7 = vcmp.eq.f32.partialorder %v858_v40, 8.507059e+37 }
 0x362   :  { %v1516_v6 = vpop.eup %1515 }
 0x363   :  { %v833_v16 = vadd.f32 1.0, %v1516_v6 }
 0x364   :  { %v1518_v7 = vpop.eup %1517 }
 0x365   :  { %v1520_v4 = vpop.eup %1519  ;;  %v835_v9 = vmul.f32 %v1518_v7, %v831_v1  ;;  %1521 = vrcp.f32 %v833_v16  ;;  %vm840_vm0 = vweird.f32 %v1518_v7  ;;  %vm869_vm9 = vweird.f32 %v833_v16 }
 0x366   :  { %v850_v8 = vmul.f32 %v1520_v4, %v832_v50  ;;  %1523 = vtanh.f32 %v821_v11  ;;  %vm855_vm1 = vweird.f32 %v1520_v4  ;;  %vm841_vm3 = vmor %vm839_vm2, %vm840_vm0  ;;  %v873_v50 = vand.u32 2147483647, %v833_v16 }
 0x367   :  { %v836_v19 = vsub.f32 1.0, %v835_v9  ;;  %vm856_vm6 = vmor %vm854_vm4, %vm855_vm1  ;;  %v861_v9 = vor.u32 1.1754944e-38, %v860_v5 }
 0x368   :  { %v851_v15 = vsub.f32 1.0, %v850_v8  ;;  %vm874_vm11 = vcmp.eq.f32.partialorder %v873_v50, 8.507059e+37 }
 0x369   :  { %v837_v14 = vmul.f32 %v1518_v7, %v836_v19 }
 0x36a   :  { %v852_v38 = vmul.f32 %v1520_v4, %v851_v15 }
 0x36b   :  { %v1522_v10 = vpop.eup %1521  ;;  %v838_v6 = vadd.f32 %v1518_v7, %v837_v14 }
 0x36c   :  { %v865_v17 = vmul.f32 %v1522_v10, %v833_v16  ;;  %v853_v13 = vadd.f32 %v1520_v4, %v852_v38  ;;  %v1524_v11 = vpop.eup %1523  ;;  %vm870_vm8 = vweird.f32 %v1522_v10  ;;  %v875_v38 = vand.u32 2147483648, %v833_v16  ;;  %v891_v16 = vld [vmem:[#allocation6 + $0xb8] sm:$0xff] }
 0x36d   :  { %v842_v37 = vsel %vm841_vm3, %v1518_v7, %v838_v6  ;;  %vm871_vm10 = vmor %vm869_vm9, %vm870_vm8 }
 0x36e   :  { %v866_v8 = vsub.f32 1.0, %v865_v17  ;;  %v847_v19 = vsel %vm844_vm5, %v846_v20, %v842_v37  ;;  %v857_v56 = vsel %vm856_vm6, %v1520_v4, %v853_v13  ;;  %v876_v2 = vor.u32 1.1754944e-38, %v875_v38 }
 0x36f   :  { %v862_v15 = vsel %vm859_vm7, %v861_v9, %v857_v56  ;;  %v880_v41 = vmul.f32 %v847_v19, %v2460_v18 }
 0x370   :  { %v867_v12 = vmul.f32 %v1522_v10, %v866_v8  ;;  %v881_v1 = vmul.f32 %v1524_v11, %v862_v15 }
 0x372   :  { %v2528_v14 = vadd.f32 %v881_v1, %v880_v41  ;;  %v868_v3 = vadd.f32 %v1522_v10, %v867_v12 }
 0x374   :  { %1525 = vtanh.f32 %v2528_v14  ;;  %v872_v7 = vsel %vm871_vm10, %v1522_v10, %v868_v3 }
 0x375   :  { %v877_v13 = vsel %vm874_vm11, %v876_v2, %v872_v7 }
 0x37a   :  { %v1526_v37 = vpop.eup %1525 }
 0x37b   :  { %v884_v56 = vmul.f32 %v1526_v37, %v877_v13 }
 0x37d   :  { %886 = vst [vmem:[#allocation9 + $0x20] sm:$0xff] %v884_v56  ;;  %908 = vmatmul.f32.vlgmr.msrb.gmra.mxu0 %v884_v56  ;;  %928 = vmatmul.f32.vlgmr.msrb.gmra.mxu1 %v884_v56 }
 0x37e   :  { %948 = vmatmul.f32.vlgmr.msrb.gmra.mxu2 %v884_v56  ;;  %968 = vmatmul.f32.vlgmr.msrb.gmra.mxu3 %v884_v56 }
 0x37f   :  { %1200 = vmatpush.msrb.mxu0 %v2267_v53  ;;  %1220 = vmatpush.msrb.mxu1 %v2270_v21  ;;  %v2856_v53 = vld [vmem:[#allocation21_spill] sm:$0xff]  ;;  %v2857_v21 = vld [vmem:[#allocation22_spill] sm:$0xff] }
 0x380   :  { %1240 = vmatpush.msrb.mxu2 %v2273_v22  ;;  %1260 = vmatpush.msrb.mxu3 %v2276_v23  ;;  %v2858_v22 = vld [vmem:[#allocation35_spill] sm:$0xff] }
 0x381   :  { %1201 = vmatpush.msrb.mxu0 %v2279_v24  ;;  %1221 = vmatpush.msrb.mxu1 %v2282_v25  ;;  %v2859_v23 = vld [vmem:[#allocation23_spill] sm:$0xff]  ;;  %v2860_v24 = vld [vmem:[#allocation24_spill] sm:$0xff]  ;;  %v2861_v25 = vld [vmem:[#allocation25_spill] sm:$0xff] }
 0x382   :  { %1241 = vmatpush.msrb.mxu2 %v2285_v26  ;;  %1261 = vmatpush.msrb.mxu3 %v2288_v27  ;;  %v2862_v26 = vld [vmem:[#allocation39_spill] sm:$0xff]  ;;  %v2863_v27 = vld [vmem:[#allocation26_spill] sm:$0xff] }
 0x383   :  { %1202 = vmatpush.msrb.mxu0 %v2291_v28  ;;  %1222 = vmatpush.msrb.mxu1 %v2294_v29  ;;  %v2864_v28 = vld [vmem:[#allocation27_spill] sm:$0xff]  ;;  %v2865_v29 = vld [vmem:[#allocation28_spill] sm:$0xff] }
 0x384   :  { %1242 = vmatpush.msrb.mxu2 %v2297_v30  ;;  %1262 = vmatpush.msrb.mxu3 %v2300_v31  ;;  %v2866_v30 = vld [vmem:[#allocation43_spill] sm:$0xff]  ;;  %v2867_v31 = vld [vmem:[#allocation29_spill] sm:$0xff] }
 0x385   :  { %1203 = vmatpush.msrb.mxu0 %v2303_v32  ;;  %1223 = vmatpush.msrb.mxu1 %v2306_v33  ;;  %v2868_v32 = vld [vmem:[#allocation30_spill] sm:$0xff]  ;;  %v2869_v33 = vld [vmem:[#allocation31_spill] sm:$0xff] }
 0x386   :  { %1243 = vmatpush.msrb.mxu2 %v2309_v35  ;;  %1263 = vmatpush.msrb.mxu3 %v2312_v39  ;;  %v2870_v35 = vld [vmem:[#allocation44_spill] sm:$0xff] }
 0x387   :  { %1204 = vmatpush.msrb.mxu0 %v2315_v43  ;;  %1224 = vmatpush.msrb.mxu1 %v2318_v47  ;;  %v2871_v39 = vld [vmem:[#allocation32_spill] sm:$0xff]  ;;  %v2872_v43 = vld [vmem:[#allocation33_spill] sm:$0xff]  ;;  %v2873_v47 = vld [vmem:[#allocation34_spill] sm:$0xff] }
 0x388   :  { %1244 = vmatpush.msrb.mxu2 %v2321_v60  ;;  %1264 = vmatpush.msrb.mxu3 %v2324_v59  ;;  %v2874_v60 = vld [vmem:[#allocation45_spill] sm:$0xff]  ;;  %v2875_v59 = vld [vmem:[#allocation36_spill] sm:$0xff] }
 0x389   :  { %1205 = vmatpush.msrb.mxu0 %v2327_v34  ;;  %1225 = vmatpush.msrb.mxu1 %v2330_v36  ;;  %v2876_v34 = vld [vmem:[#allocation37_spill] sm:$0xff]  ;;  %v2877_v36 = vld [vmem:[#allocation38_spill] sm:$0xff] }
 0x38a   :  { %1245 = vmatpush.msrb.mxu2 %v2333_v51  ;;  %1265 = vmatpush.msrb.mxu3 %v2336_v49  ;;  %v2878_v51 = vld [vmem:[#allocation46_spill] sm:$0xff]  ;;  %v2879_v49 = vld [vmem:[#allocation40_spill] sm:$0xff] }
 0x38b   :  { %1206 = vmatpush.msrb.mxu0 %v2339_v57  ;;  %1226 = vmatpush.msrb.mxu1 %v2342_v44  ;;  %v2880_v57 = vld [vmem:[#allocation41_spill] sm:$0xff]  ;;  %v2881_v44 = vld [vmem:[#allocation42_spill] sm:$0xff] }
 0x38c   :  { %1246 = vmatpush.msrb.mxu2 %v2345_v55  ;;  %1266 = vmatpush.msrb.mxu3 %v2348_v52  ;;  %v888_v55 = vld [vmem:[#allocation6 + $0xa0] sm:$0xff]  ;;  %v889_v52 = vld [vmem:[#allocation6 + $0xa8] sm:$0xff] }
 0x38d   :  { %1207 = vmatpush.msrb.mxu0 %v2351_v48  ;;  %1227 = vmatpush.msrb.mxu1 %v2354_v54 }
 0x38e   :  { %1247 = vmatpush.msrb.mxu2 %v2357_v42  ;;  %1267 = vmatpush.msrb.mxu3 %v2360_v46 }
 0x38f   :  { %1208 = vmatpush.msrb.mxu0 %v2363_v45  ;;  %1228 = vmatpush.msrb.mxu1 %v2366_v58 }
 0x390   :  { %1248 = vmatpush.msrb.mxu2 %v2369_v0  ;;  %1268 = vmatpush.msrb.mxu3 %v2372_v62  ;;  %v890_v0 = vld [vmem:[#allocation6 + $0xb0] sm:$0xff] }
 0x391   :  { %1209 = vmatpush.msrb.mxu0 %v2375_v63  ;;  %1229 = vmatpush.msrb.mxu1 %v2378_v61 }
 0x392   :  { %1249 = vmatpush.msrb.mxu2 %v2856_v53  ;;  %1269 = vmatpush.msrb.mxu3 %v2857_v21 }
 0x393   :  { %1210 = vmatpush.msrb.mxu0 %v2858_v22  ;;  %1230 = vmatpush.msrb.mxu1 %v2859_v23 }
 0x394   :  { %1250 = vmatpush.msrb.mxu2 %v2860_v24  ;;  %1270 = vmatpush.msrb.mxu3 %v2861_v25 }
 0x395   :  { %1211 = vmatpush.msrb.mxu0 %v2862_v26  ;;  %1231 = vmatpush.msrb.mxu1 %v2863_v27 }
 0x396   :  { %1251 = vmatpush.msrb.mxu2 %v2864_v28  ;;  %1271 = vmatpush.msrb.mxu3 %v2865_v29 }
 0x397   :  { %1212 = vmatpush.msrb.mxu0 %v2866_v30  ;;  %1232 = vmatpush.msrb.mxu1 %v2867_v31 }
 0x398   :  { %1252 = vmatpush.msrb.mxu2 %v2868_v32  ;;  %1272 = vmatpush.msrb.mxu3 %v2869_v33 }
 0x399   :  { %1213 = vmatpush.msrb.mxu0 %v2870_v35  ;;  %1233 = vmatpush.msrb.mxu1 %v2871_v39 }
 0x39a   :  { %1253 = vmatpush.msrb.mxu2 %v2872_v43  ;;  %1273 = vmatpush.msrb.mxu3 %v2873_v47 }
 0x39b   :  { %1214 = vmatpush.msrb.mxu0 %v2874_v60  ;;  %1234 = vmatpush.msrb.mxu1 %v2875_v59 }
 0x39c   :  { %1254 = vmatpush.msrb.mxu2 %v2876_v34  ;;  %1274 = vmatpush.msrb.mxu3 %v2877_v36  ;;  %v1043_v34 = vld [vmem:[#allocation6 + $0xc8] sm:$0xff] }
 0x39d   :  { %1215 = vmatpush.msrb.mxu0 %v2878_v51  ;;  %1235 = vmatpush.msrb.mxu1 %v2879_v49 }
 0x39e   :  { %1255 = vmatpush.msrb.mxu2 %v2880_v57  ;;  %1275 = vmatpush.msrb.mxu3 %v2881_v44 }
 0x3fa   :  { %v909_v48 = vpop.f32.mrf.mxu0  ;;  %v929_v54 = vpop.f32.mrf.mxu1 }
 0x3fb   :  { %v972_v42 = vadd.f32 %v909_v48, %v888_v55  ;;  %v973_v46 = vadd.f32 %v929_v54, %v889_v52  ;;  %v1044_v52 = vld [vmem:[#allocation6 + $0xd0] sm:$0xff] }
 0x3fd   :  { %v1427_v45 = vmul.f32 -1.442695, %v972_v42  ;;  %v1428_v58 = vmul.f32 -1.442695, %v973_v46 }
 0x3ff   :  { %1527 = vpow2.f32 %v1427_v45 }
 0x400   :  { %1529 = vpow2.f32 %v1428_v58 }
 0x401   :  { %v949_v62 = vpop.f32.mrf.mxu2  ;;  %v969_v4 = vpop.f32.mrf.mxu3 }
 0x402   :  { %v974_v63 = vadd.f32 %v949_v62, %v890_v0  ;;  %v975_v20 = vadd.f32 %v969_v4, %v891_v16  ;;  %v1045_v62 = vld [vmem:[#allocation6 + $0xd8] sm:$0xff] }
 0x404   :  { %v1429_v61 = vmul.f32 -1.442695, %v974_v63 }
 0x405   :  { %v1528_v18 = vpop.eup %1527 }
 0x406   :  { %v1530_v12 = vpop.eup %1529  ;;  %v985_v41 = vadd.f32 1.0, %v1528_v18  ;;  %1531 = vpow2.f32 %v1429_v61 }
 0x407   :  { %v986_v10 = vadd.f32 1.0, %v1530_v12 }
 0x408   :  { %1533 = vrcp.f32 %v985_v41  ;;  %v999_v19 = vand.u32 2147483648, %v985_v41  ;;  %v997_v3 = vand.u32 2147483647, %v985_v41  ;;  %vm993_vm14 = vweird.f32 %v985_v41 }
 0x409   :  { %1535 = vrcp.f32 %v986_v10  ;;  %v1014_v38 = vand.u32 2147483648, %v986_v10  ;;  %v1012_v7 = vand.u32 2147483647, %v986_v10  ;;  %vm1008_vm0 = vweird.f32 %v986_v10 }
 0x40a   :  { %v1000_v13 = vor.u32 1.1754944e-38, %v999_v19  ;;  %vm998_vm1 = vcmp.eq.f32.partialorder %v997_v3, 8.507059e+37 }
 0x40b   :  { %v1015_v22 = vor.u32 1.1754944e-38, %v1014_v38  ;;  %vm1013_vm3 = vcmp.eq.f32.partialorder %v1012_v7, 8.507059e+37 }
 0x40c   :  { %v1532_v5 = vpop.eup %1531 }
 0x40d   :  { %v987_v40 = vadd.f32 1.0, %v1532_v5 }
 0x40e   :  { %v1534_v6 = vpop.eup %1533 }
 0x40f   :  { %v1536_v17 = vpop.eup %1535  ;;  %v989_v9 = vmul.f32 %v1534_v6, %v985_v41  ;;  %1537 = vrcp.f32 %v987_v40  ;;  %vm994_vm12 = vweird.f32 %v1534_v6  ;;  %v1029_v33 = vand.u32 2147483648, %v987_v40 }
 0x410   :  { %v1004_v11 = vmul.f32 %v1536_v17, %v986_v10  ;;  %1539 = vtanh.f32 %v975_v20  ;;  %vm1009_vm13 = vweird.f32 %v1536_v17  ;;  %vm995_vm15 = vmor %vm993_vm14, %vm994_vm12  ;;  %vm1023_vm5 = vweird.f32 %v987_v40 }
 0x411   :  { %v990_v8 = vsub.f32 1.0, %v989_v9  ;;  %vm1010_vm2 = vmor %vm1008_vm0, %vm1009_vm13  ;;  %v1027_v35 = vand.u32 2147483647, %v987_v40  ;;  %v1030_v43 = vor.u32 1.1754944e-38, %v1029_v33 }
 0x412   :  { %v1005_v15 = vsub.f32 1.0, %v1004_v11 }
 0x413   :  { %v991_v1 = vmul.f32 %v1534_v6, %v990_v8  ;;  %vm1028_vm7 = vcmp.eq.f32.partialorder %v1027_v35, 8.507059e+37  ;;  %v1197_v35 = vld [vmem:[#allocation6 + $0xe8] sm:$0xff] }
 0x414   :  { %v1006_v50 = vmul.f32 %v1536_v17, %v1005_v15 }
 0x415   :  { %v1538_v2 = vpop.eup %1537  ;;  %v992_v37 = vadd.f32 %v1534_v6, %v991_v1 }
 0x416   :  { %v1019_v56 = vmul.f32 %v1538_v2, %v987_v40  ;;  %v1007_v53 = vadd.f32 %v1536_v17, %v1006_v50  ;;  %v1540_v23 = vpop.eup %1539  ;;  %vm1024_vm4 = vweird.f32 %v1538_v2 }
 0x417   :  { %v996_v21 = vsel %vm995_vm15, %v1534_v6, %v992_v37  ;;  %vm1025_vm6 = vmor %vm1023_vm5, %vm1024_vm4 }
 0x418   :  { %v1020_v24 = vsub.f32 1.0, %v1019_v56  ;;  %v1001_v25 = vsel %vm998_vm1, %v1000_v13, %v996_v21  ;;  %v1011_v26 = vsel %vm1010_vm2, %v1536_v17, %v1007_v53 }
 0x419   :  { %v1016_v27 = vsel %vm1013_vm3, %v1015_v22, %v1011_v26  ;;  %v1034_v28 = vmul.f32 %v1001_v25, %v2528_v14  ;;  %v1042_v14 = vld [vmem:[#allocation6 + $0xc0] sm:$0xff] }
 0x41a   :  { %v1021_v29 = vmul.f32 %v1538_v2, %v1020_v24  ;;  %v1035_v30 = vmul.f32 %v1540_v23, %v1016_v27 }
 0x41c   :  { %v2596_v31 = vadd.f32 %v1035_v30, %v1034_v28  ;;  %v1022_v32 = vadd.f32 %v1538_v2, %v1021_v29 }
 0x41e   :  { %1541 = vtanh.f32 %v2596_v31  ;;  %v1026_v39 = vsel %vm1025_vm6, %v1538_v2, %v1022_v32 }
 0x41f   :  { %v1031_v60 = vsel %vm1028_vm7, %v1030_v43, %v1026_v39 }
 0x424   :  { %v1542_v47 = vpop.eup %1541 }
 0x425   :  { %v1038_v59 = vmul.f32 %v1542_v47, %v1031_v60 }
 0x427   :  { %1040 = vst [vmem:[#allocation9 + $0x28] sm:$0xff] %v1038_v59  ;;  %1062 = vmatmul.f32.vlgmr.msra.gmra.mxu0 %v1038_v59  ;;  %1082 = vmatmul.f32.vlgmr.msra.gmra.mxu1 %v1038_v59 }
 0x428   :  { %1102 = vmatmul.f32.vlgmr.msra.gmra.mxu2 %v1038_v59  ;;  %1122 = vmatmul.f32.vlgmr.msra.gmra.mxu3 %v1038_v59 }
 0x4a4   :  { %v1063_v36 = vpop.f32.mrf.mxu0  ;;  %v1083_v51 = vpop.f32.mrf.mxu1 }
 0x4a5   :  { %v1126_v49 = vadd.f32 %v1063_v36, %v1042_v14  ;;  %v1127_v57 = vadd.f32 %v1083_v51, %v1043_v34  ;;  %v1198_v34 = vld [vmem:[#allocation6 + $0xf0] sm:$0xff] }
 0x4a7   :  { %v1430_v44 = vmul.f32 -1.442695, %v1126_v49  ;;  %v1431_v55 = vmul.f32 -1.442695, %v1127_v57 }
 0x4a9   :  { %1543 = vpow2.f32 %v1430_v44 }
 0x4aa   :  { %1545 = vpow2.f32 %v1431_v55 }
 0x4ab   :  { %v1103_v48 = vpop.f32.mrf.mxu2  ;;  %v1123_v63 = vpop.f32.mrf.mxu3 }
 0x4ac   :  { %v1128_v54 = vadd.f32 %v1103_v48, %v1044_v52  ;;  %v1129_v41 = vadd.f32 %v1123_v63, %v1045_v62  ;;  %v1199_v48 = vld [vmem:[#allocation6 + $0xf8] sm:$0xff] }
 0x4ae   :  { %v1432_v42 = vmul.f32 -1.442695, %v1128_v54 }
 0x4af   :  { %v1544_v46 = vpop.eup %1543 }
 0x4b0   :  { %v1546_v45 = vpop.eup %1545  ;;  %v1139_v58 = vadd.f32 1.0, %v1544_v46  ;;  %1547 = vpow2.f32 %v1432_v42 }
 0x4b1   :  { %v1140_v0 = vadd.f32 1.0, %v1546_v45 }
 0x4b2   :  { %1549 = vrcp.f32 %v1139_v58  ;;  %v1153_v40 = vand.u32 2147483648, %v1139_v58  ;;  %v1151_v17 = vand.u32 2147483647, %v1139_v58  ;;  %vm1147_vm10 = vweird.f32 %v1139_v58 }
 0x4b3   :  { %1551 = vrcp.f32 %v1140_v0  ;;  %v1168_v9 = vand.u32 2147483648, %v1140_v0  ;;  %v1166_v8 = vand.u32 2147483647, %v1140_v0  ;;  %vm1162_vm12 = vweird.f32 %v1140_v0 }
 0x4b4   :  { %v1154_v1 = vor.u32 1.1754944e-38, %v1153_v40  ;;  %vm1152_vm13 = vcmp.eq.f32.partialorder %v1151_v17, 8.507059e+37 }
 0x4b5   :  { %v1169_v7 = vor.u32 1.1754944e-38, %v1168_v9  ;;  %vm1167_vm15 = vcmp.eq.f32.partialorder %v1166_v8, 8.507059e+37 }
 0x4b6   :  { %v1548_v61 = vpop.eup %1547 }
 0x4b7   :  { %v1141_v18 = vadd.f32 1.0, %v1548_v61 }
 0x4b8   :  { %v1550_v12 = vpop.eup %1549 }
 0x4b9   :  { %v1552_v10 = vpop.eup %1551  ;;  %v1143_v16 = vmul.f32 %v1550_v12, %v1139_v58  ;;  %1553 = vrcp.f32 %v1141_v18  ;;  %vm1148_vm8 = vweird.f32 %v1550_v12  ;;  %v1183_v26 = vand.u32 2147483648, %v1141_v18 }
 0x4ba   :  { %v1158_v4 = vmul.f32 %v1552_v10, %v1140_v0  ;;  %1555 = vtanh.f32 %v1129_v41  ;;  %vm1163_vm9 = vweird.f32 %v1552_v10  ;;  %vm1149_vm11 = vmor %vm1147_vm10, %vm1148_vm8  ;;  %vm1177_vm1 = vweird.f32 %v1141_v18 }
 0x4bb   :  { %v1144_v5 = vsub.f32 1.0, %v1143_v16  ;;  %vm1164_vm14 = vmor %vm1162_vm12, %vm1163_vm9  ;;  %v1181_v27 = vand.u32 2147483647, %v1141_v18  ;;  %v1184_v29 = vor.u32 1.1754944e-38, %v1183_v26 }
 0x4bc   :  { %v1159_v6 = vsub.f32 1.0, %v1158_v4 }
 0x4bd   :  { %v1145_v20 = vmul.f32 %v1550_v12, %v1144_v5  ;;  %vm1182_vm3 = vcmp.eq.f32.partialorder %v1181_v27, 8.507059e+37 }
 0x4be   :  { %v1160_v11 = vmul.f32 %v1552_v10, %v1159_v6 }
 0x4bf   :  { %v1554_v19 = vpop.eup %1553  ;;  %v1146_v15 = vadd.f32 %v1550_v12, %v1145_v20 }
 0x4c0   :  { %v1173_v3 = vmul.f32 %v1554_v19, %v1141_v18  ;;  %v1161_v38 = vadd.f32 %v1552_v10, %v1160_v11  ;;  %v1556_v2 = vpop.eup %1555  ;;  %vm1178_vm0 = vweird.f32 %v1554_v19 }
 0x4c1   :  { %v1150_v50 = vsel %vm1149_vm11, %v1550_v12, %v1146_v15  ;;  %vm1179_vm2 = vmor %vm1177_vm1, %vm1178_vm0 }
 0x4c2   :  { %v1174_v37 = vsub.f32 1.0, %v1173_v3  ;;  %v1155_v13 = vsel %vm1152_vm13, %v1154_v1, %v1150_v50  ;;  %v1165_v56 = vsel %vm1164_vm14, %v1552_v10, %v1161_v38 }
 0x4c3   :  { %v1170_v53 = vsel %vm1167_vm15, %v1169_v7, %v1165_v56  ;;  %v1188_v21 = vmul.f32 %v1155_v13, %v2596_v31  ;;  %v1196_v31 = vld [vmem:[#allocation6 + $0xe0] sm:$0xff] }
 0x4c4   :  { %v1175_v22 = vmul.f32 %v1554_v19, %v1174_v37  ;;  %v1189_v23 = vmul.f32 %v1556_v2, %v1170_v53 }
 0x4c6   :  { %v2600_v24 = vadd.f32 %v1189_v23, %v1188_v21  ;;  %v1176_v25 = vadd.f32 %v1554_v19, %v1175_v22 }
 0x4c8   :  { %1557 = vtanh.f32 %v2600_v24  ;;  %v1180_v28 = vsel %vm1179_vm2, %v1554_v19, %v1176_v25 }
 0x4c9   :  { %v1185_v32 = vsel %vm1182_vm3, %v1184_v29, %v1180_v28 }
 0x4ce   :  { %v1558_v30 = vpop.eup %1557 }
 0x4cf   :  { %v1192_v33 = vmul.f32 %v1558_v30, %v1185_v32 }
 0x4d1   :  { %1194 = vst [vmem:[#allocation9 + $0x30] sm:$0xff] %v1192_v33  ;;  %1216 = vmatmul.f32.vlgmr.msrb.gmra.mxu0 %v1192_v33  ;;  %1236 = vmatmul.f32.vlgmr.msrb.gmra.mxu1 %v1192_v33 }
 0x4d2   :  { %1256 = vmatmul.f32.vlgmr.msrb.gmra.mxu2 %v1192_v33  ;;  %1276 = vmatmul.f32.vlgmr.msrb.gmra.mxu3 %v1192_v33 }
 0x54e   :  { %v1217_v39 = vpop.f32.mrf.mxu0  ;;  %v1237_v43 = vpop.f32.mrf.mxu1 }
 0x54f   :  { %v1280_v47 = vadd.f32 %v1217_v39, %v1196_v31  ;;  %v1281_v60 = vadd.f32 %v1237_v43, %v1197_v35 }
 0x551   :  { %v1433_v59 = vmul.f32 -1.442695, %v1280_v47  ;;  %v1434_v14 = vmul.f32 -1.442695, %v1281_v60 }
 0x553   :  { %1559 = vpow2.f32 %v1433_v59 }
 0x554   :  { %1561 = vpow2.f32 %v1434_v14 }
 0x555   :  { %v1257_v36 = vpop.f32.mrf.mxu2  ;;  %v1277_v54 = vpop.f32.mrf.mxu3 }
 0x556   :  { %v1282_v51 = vadd.f32 %v1257_v36, %v1198_v34  ;;  %v1283_v58 = vadd.f32 %v1277_v54, %v1199_v48 }
 0x558   :  { %v1435_v49 = vmul.f32 -1.442695, %v1282_v51 }
 0x559   :  { %v1560_v57 = vpop.eup %1559 }
 0x55a   :  { %v1562_v44 = vpop.eup %1561  ;;  %v1293_v55 = vadd.f32 1.0, %v1560_v57  ;;  %1563 = vpow2.f32 %v1435_v49 }
 0x55b   :  { %v1294_v52 = vadd.f32 1.0, %v1562_v44 }
 0x55c   :  { %1565 = vrcp.f32 %v1293_v55  ;;  %v1307_v18 = vand.u32 2147483648, %v1293_v55  ;;  %v1305_v10 = vand.u32 2147483647, %v1293_v55  ;;  %vm1301_vm6 = vweird.f32 %v1293_v55 }
 0x55d   :  { %1567 = vrcp.f32 %v1294_v52  ;;  %v1322_v16 = vand.u32 2147483648, %v1294_v52  ;;  %v1320_v5 = vand.u32 2147483647, %v1294_v52  ;;  %vm1316_vm8 = vweird.f32 %v1294_v52 }
 0x55e   :  { %v1308_v20 = vor.u32 1.1754944e-38, %v1307_v18  ;;  %vm1306_vm9 = vcmp.eq.f32.partialorder %v1305_v10, 8.507059e+37 }
 0x55f   :  { %v1323_v8 = vor.u32 1.1754944e-38, %v1322_v16  ;;  %vm1321_vm11 = vcmp.eq.f32.partialorder %v1320_v5, 8.507059e+37 }
 0x560   :  { %v1564_v42 = vpop.eup %1563 }
 0x561   :  { %v1295_v46 = vadd.f32 1.0, %v1564_v42 }
 0x562   :  { %v1566_v45 = vpop.eup %1565 }
 0x563   :  { %v1568_v0 = vpop.eup %1567  ;;  %v1297_v62 = vmul.f32 %v1566_v45, %v1293_v55  ;;  %1569 = vrcp.f32 %v1295_v46  ;;  %vm1302_vm4 = vweird.f32 %v1566_v45  ;;  %v1337_v56 = vand.u32 2147483648, %v1295_v46 }
 0x564   :  { %v1312_v63 = vmul.f32 %v1568_v0, %v1294_v52  ;;  %1571 = vtanh.f32 %v1283_v58  ;;  %vm1317_vm5 = vweird.f32 %v1568_v0  ;;  %vm1303_vm7 = vmor %vm1301_vm6, %vm1302_vm4  ;;  %vm1331_vm13 = vweird.f32 %v1295_v46 }
 0x565   :  { %v1298_v61 = vsub.f32 1.0, %v1297_v62  ;;  %vm1318_vm10 = vmor %vm1316_vm8, %vm1317_vm5  ;;  %v1335_v53 = vand.u32 2147483647, %v1295_v46  ;;  %v1338_v22 = vor.u32 1.1754944e-38, %v1337_v56 }
 0x566   :  { %v1313_v12 = vsub.f32 1.0, %v1312_v63 }
 0x567   :  { %v1299_v41 = vmul.f32 %v1566_v45, %v1298_v61  ;;  %vm1336_vm15 = vcmp.eq.f32.partialorder %v1335_v53, 8.507059e+37 }
 0x568   :  { %v1314_v4 = vmul.f32 %v1568_v0, %v1313_v12 }
 0x569   :  { %v1570_v40 = vpop.eup %1569  ;;  %v1300_v6 = vadd.f32 %v1566_v45, %v1299_v41 }
 0x56a   :  { %v1327_v17 = vmul.f32 %v1570_v40, %v1295_v46  ;;  %v1315_v9 = vadd.f32 %v1568_v0, %v1314_v4  ;;  %v1572_v19 = vpop.eup %1571  ;;  %vm1332_vm12 = vweird.f32 %v1570_v40 }
 0x56b   :  { %v1304_v11 = vsel %vm1303_vm7, %v1566_v45, %v1300_v6  ;;  %vm1333_vm14 = vmor %vm1331_vm13, %vm1332_vm12 }
 0x56c   :  { %v1328_v15 = vsub.f32 1.0, %v1327_v17  ;;  %v1309_v1 = vsel %vm1306_vm9, %v1308_v20, %v1304_v11  ;;  %v1319_v3 = vsel %vm1318_vm10, %v1568_v0, %v1315_v9 }
 0x56d   :  { %v1324_v38 = vsel %vm1321_vm11, %v1323_v8, %v1319_v3  ;;  %v1342_v50 = vmul.f32 %v1309_v1, %v2600_v24 }
 0x56e   :  { %v1343_v7 = vmul.f32 %v1572_v19, %v1324_v38  ;;  %v1329_v2 = vmul.f32 %v1570_v40, %v1328_v15 }
 0x570   :  { %v1344_v37 = vadd.f32 %v1343_v7, %v1342_v50  ;;  %v1330_v13 = vadd.f32 %v1570_v40, %v1329_v2 }
 0x572   :  { %1573 = vtanh.f32 %v1344_v37  ;;  %1355 = vst [vmem:[#allocation12] sm:$0xff] %v1344_v37  ;;  %v1334_v21 = vsel %vm1333_vm14, %v1570_v40, %v1330_v13 }
 0x573   :  { %v1339_v24 = vsel %vm1336_vm15, %v1338_v22, %v1334_v21 }
 0x578   :  { %v1574_v23 = vpop.eup %1573 }
 0x579   :  { %v1346_v25 = vmul.f32 %v1574_v23, %v1339_v24 }
 0x57b   :  { %1348 = vst [vmem:[#allocation9 + $0x38] sm:$0xff] %v1346_v25 }
 0x57c   :  { %1354 = vst [vmem:[#allocation10] sm:$0xff] %v1346_v25  ;;  %1368 = dma.vmem_to_hbm [thread:$0]  %s1361_s1, 1024, %s1363_s29, [#allocation8], %s1775_s2, %s1775_s2, %s1776_s3  }
 0x57d   :  { %1379 = dma.vmem_to_hbm [thread:$0]  %s1375_s5, 128, %s1377_s8, [#allocation11]  }
 0x57e   :  { %1390 = dma.vmem_to_hbm [thread:$0]  %s1386_s10, 128, %s1388_s13, [#allocation11]  }
 0x57f   :  { %1763 = dma.done.wait [#allocation8], 1024  }
 0x580   :  { %1764 = vsyncadd [#allocation8], 4294966272 }
 0x581   :  { %1765 = dma.done.wait [#allocation11], 256  }
 0x582   :  { %1766 = vsyncadd [#allocation11], 4294967040 }
 0x583   :  { %1403 = vsyncpa [#allocation7], 1 }
 0x584   :  { %1404 = vsyncpa [#allocation8], 1 }
 0x585   :  { %1405 = vsyncpa [#allocation11], 1 }
 0x586   :  { %1406 = vsyncmov [#allocation3] }
 0x589   :  { %s1407_s4 = vpop.sfrf %1406 }
 0x58a   :  { %p1436_p0 = scmp.ne.s32.totalorder %s1407_s4, 0 }
 0x58c   :  { %1411 = shalt.err (%p1436_p0)  }

</bundles_post_ra>
